<compile_context>
chip_gen: v7x
topology: tpu7x:2x2x1
jax: 0.10.0
libtpu: 0.0.40
codegen_flags: <defaults>
</compile_context>

<pallas_src>
import math

import jax
import jax.numpy as jnp
from jax.experimental import pallas as pl
from jax.experimental.pallas import tpu as pltpu


_MIB = 1024 * 1024
_FUSED_VMEM_BUDGET = 20 * _MIB     # use the fused, weight-resident kernel below this
_VMEM_LIMIT_CAP = 40 * _MIB        # explicit scoped-VMEM request (safe on v5e/v6e/v7x)


def _round_up(n, m):
    return ((n + m - 1) // m) * m


def _vmem_limit(est_bytes):
    return int(min(_VMEM_LIMIT_CAP, max(2 * est_bytes, 16 * _MIB)))


def _pick_batch_tile(B):
    """Batch tile: multiple of 8, <=256 rows per MXU pass, >=2 grid steps
    whenever B permits (so both v7x TensorCores get work via the 'parallel'
    batch axis and DMA/writeback has something to overlap with)."""
    B_sub = _round_up(B, 8)
    if B_sub <= 8:
        return B_sub
    return min(256, _round_up(pl.cdiv(B_sub, 2), 8))


def _fused_vmem_estimate(TB, D_pad, E_pad, x_itemsize, w_itemsize):
    """Double-buffered tiles + resident weights for the fused kernel."""
    return (2 * TB * D_pad * x_itemsize          # x tile
            + 2 * D_pad * E_pad * w_itemsize     # w1
            + 2 * E_pad * D_pad * w_itemsize     # w2
            + 2 * (E_pad + D_pad) * 4            # biases (f32)
            + 2 * TB * E_pad * x_itemsize        # encoded tile
            + 2 * TB * D_pad * x_itemsize)       # decoded tile


# -----------------------------------------------------------------------------
# Kernels
# -----------------------------------------------------------------------------

def _fused_kernel(x_ref, w1_ref, b1_ref, w2_ref, b2_ref, enc_ref, dec_ref):
    """Whole-weight-resident encoder+decoder for one batch tile.

    x_ref  : (TB, Dp) f32   w1_ref: (Dp, Ep) bf16   b1_ref: (1, Ep) f32
    w2_ref : (Ep, Dp) bf16  b2_ref: (1, Dp) f32
    enc_ref: (TB, Ep)       dec_ref: (TB, Dp)
    """
    x = x_ref[...].astype(w1_ref.dtype)              # f32 -> bf16 in VMEM (MXU operand)
    h = jnp.dot(x, w1_ref[...], preferred_element_type=jnp.float32)
    enc = jnp.maximum(h + b1_ref[...], 0.0)          # bias + ReLU in f32
    enc_ref[...] = enc.astype(enc_ref.dtype)

    d = jnp.dot(enc.astype(w2_ref.dtype), w2_ref[...],
                preferred_element_type=jnp.float32)
    dec_ref[...] = jnp.maximum(d + b2_ref[...], 0.0).astype(dec_ref.dtype)


def _encoder_kernel(x_ref, w1_ref, b1_ref, enc_ref, acc_ref):
    """K-tiled encoder: accumulate partial x@w1 over D tiles, finalize on last k."""
    k = pl.program_id(1)

    @pl.when(k == 0)
    def _():
        acc_ref[...] = jnp.zeros_like(acc_ref)

    x = x_ref[...].astype(w1_ref.dtype)
    acc_ref[...] += jnp.dot(x, w1_ref[...], preferred_element_type=jnp.float32)

    @pl.when(k == pl.num_programs(1) - 1)
    def _():
        enc_ref[...] = jnp.maximum(acc_ref[...] + b1_ref[...], 0.0).astype(enc_ref.dtype)


def _decoder_kernel(enc_ref, w2_ref, b2_ref, dec_ref):
    """N-tiled decoder: one (TB, Ep) x (Ep, TD) matmul + bias + ReLU per step."""
    enc = enc_ref[...].astype(w2_ref.dtype)
    d = jnp.dot(enc, w2_ref[...], preferred_element_type=jnp.float32)
    dec_ref[...] = jnp.maximum(d + b2_ref[...], 0.0).astype(dec_ref.dtype)


# -----------------------------------------------------------------------------
# Wrappers
# -----------------------------------------------------------------------------

def prepare_params(w1, b1, w2, b2, *, weight_dtype=jnp.bfloat16, max_d_tile=4096):
    """Pad + cast the parameters ONCE (hoisted out of the per-call path).

    Feature dims are padded to multiples of 128 (lane-dense), and D is padded to
    a multiple of the chosen D tile so the tiled path needs no per-call weight
    padding.  Zero padding is mathematically inert for this module because the
    padded weight rows/cols and bias entries are 0 and ReLU(0) = 0; if the
    activation is ever changed to one with f(0) != 0 this no longer holds.
    """
    D, E = w1.shape
    E_pad = _round_up(E, 128)

    max_d_tile = max(128, _round_up(max_d_tile, 128))
    D_128 = _round_up(D, 128)
    n_d_tiles = pl.cdiv(D_128, max_d_tile)
    d_tile = _round_up(pl.cdiv(D_128, n_d_tiles), 128)   # balanced D tiles
    D_pad = d_tile * n_d_tiles

    w1_p = jnp.pad(w1, ((0, D_pad - D), (0, E_pad - E))).astype(weight_dtype)
    b1_p = jnp.pad(b1, (0, E_pad - E)).astype(jnp.float32).reshape(1, E_pad)
    w2_p = jnp.pad(w2, ((0, E_pad - E), (0, D_pad - D))).astype(weight_dtype)
    b2_p = jnp.pad(b2, (0, D_pad - D)).astype(jnp.float32).reshape(1, D_pad)

    return dict(w1=w1_p, b1=b1_p, w2=w2_p, b2=b2_p,
                input_dim=D, encoding_dim=E,
                D_pad=D_pad, E_pad=E_pad, d_tile=d_tile)


def _forward_fused(x_p, params, TB):
    B_pad, D_pad = x_p.shape
    E_pad = params["E_pad"]
    dt = x_p.dtype
    w1, b1, w2, b2 = params["w1"], params["b1"], params["w2"], params["b2"]
    it = jnp.dtype(dt).itemsize
    wt = jnp.dtype(w1.dtype).itemsize

    est = _fused_vmem_estimate(TB, D_pad, E_pad, it, wt)
    cost = pl.CostEstimate(
        flops=4 * B_pad * D_pad * E_pad,
        transcendentals=0,
        bytes_accessed=it * (x_p.size + B_pad * E_pad + B_pad * D_pad)
                       + wt * (w1.size + w2.size) + 4 * (b1.size + b2.size),
    )

    return pl.pallas_call(
        _fused_kernel,
        out_shape=(jax.ShapeDtypeStruct((B_pad, E_pad), dt),
                   jax.ShapeDtypeStruct((B_pad, D_pad), dt)),
        grid=(B_pad // TB,),
        in_specs=[
            pl.BlockSpec((TB, D_pad), lambda i: (i, 0)),      # x tile
            pl.BlockSpec((D_pad, E_pad), lambda i: (0, 0)),   # w1 (resident)
            pl.BlockSpec((1, E_pad), lambda i: (0, 0)),       # b1
            pl.BlockSpec((E_pad, D_pad), lambda i: (0, 0)),   # w2 (resident)
            pl.BlockSpec((1, D_pad), lambda i: (0, 0)),       # b2
        ],
        out_specs=(pl.BlockSpec((TB, E_pad), lambda i: (i, 0)),
                   pl.BlockSpec((TB, D_pad), lambda i: (i, 0))),
        compiler_params=pltpu.CompilerParams(
            dimension_semantics=("parallel",),
            vmem_limit_bytes=_vmem_limit(est)),
        cost_estimate=cost,
    )(x_p, w1, b1, w2, b2)


def _forward_tiled(x_p, params, TB):
    """v7x-safe path for large D: K-tiled encoder + N-tiled decoder."""
    B_pad, D_pad = x_p.shape
    E_pad, TD = params["E_pad"], params["d_tile"]
    dt = x_p.dtype
    w1, b1, w2, b2 = params["w1"], params["b1"], params["w2"], params["b2"]
    nb, nd = B_pad // TB, D_pad // TD
    it = jnp.dtype(dt).itemsize
    wt = jnp.dtype(w1.dtype).itemsize

    # --- encoder: contract over D (reduction axis last, "arbitrary") ---------
    enc_est = (2 * TB * TD * it + 2 * TD * E_pad * wt
               + 2 * E_pad * 4 + TB * E_pad * 4 + 2 * TB * E_pad * it)
    enc_cost = pl.CostEstimate(
        flops=2 * B_pad * D_pad * E_pad, transcendentals=0,
        bytes_accessed=it * (x_p.size + B_pad * E_pad) + wt * nb * w1.size + 4 * E_pad)
    enc_p = pl.pallas_call(
        _encoder_kernel,
        out_shape=jax.ShapeDtypeStruct((B_pad, E_pad), dt),
        grid=(nb, nd),
        in_specs=[
            pl.BlockSpec((TB, TD), lambda i, k: (i, k)),       # x tile
            pl.BlockSpec((TD, E_pad), lambda i, k: (k, 0)),    # w1 K-tile
            pl.BlockSpec((1, E_pad), lambda i, k: (0, 0)),     # b1
        ],
        out_specs=pl.BlockSpec((TB, E_pad), lambda i, k: (i, 0)),
        scratch_shapes=[pltpu.VMEM((TB, E_pad), jnp.float32)],
        compiler_params=pltpu.CompilerParams(
            dimension_semantics=("parallel", "arbitrary"),
            vmem_limit_bytes=_vmem_limit(enc_est)),
        cost_estimate=enc_cost,
    )(x_p, w1, b1)

    # --- decoder: tile the output D dimension --------------------------------
    dec_est = (2 * TB * E_pad * it + 2 * E_pad * TD * wt
               + 2 * TD * 4 + 2 * TB * TD * it)
    dec_cost = pl.CostEstimate(
        flops=2 * B_pad * E_pad * D_pad, transcendentals=0,
        bytes_accessed=it * (nd * B_pad * E_pad + B_pad * D_pad)
                       + wt * nb * w2.size + 4 * D_pad)
    dec_p = pl.pallas_call(
        _decoder_kernel,
        out_shape=jax.ShapeDtypeStruct((B_pad, D_pad), dt),
        grid=(nb, nd),
        in_specs=[
            pl.BlockSpec((TB, E_pad), lambda i, j: (i, 0)),    # encoded tile
            pl.BlockSpec((E_pad, TD), lambda i, j: (0, j)),    # w2 N-tile
            pl.BlockSpec((1, TD), lambda i, j: (0, j)),        # b2 N-tile
        ],
        out_specs=pl.BlockSpec((TB, TD), lambda i, j: (i, j)),
        compiler_params=pltpu.CompilerParams(
            dimension_semantics=("parallel", "parallel"),
            vmem_limit_bytes=_vmem_limit(dec_est)),
        cost_estimate=dec_cost,
    )(enc_p, w2, b2)

    return enc_p, dec_p


def anime_autoencoder_forward(x, params, *, mode="auto", batch_tile=None):
    """Returns (encoded, decoded) with the original (B, E) / (B, D) shapes.

    `params` comes from prepare_params() (padded + bf16-cast once, not per call).
    """
    B, D = x.shape
    assert D == params["input_dim"]
    D_pad, E_pad = params["D_pad"], params["E_pad"]
    E = params["encoding_dim"]

    TB = _pick_batch_tile(B) if batch_tile is None else max(8, _round_up(batch_tile, 8))
    B_pad = _round_up(B, TB)

    # Pad x only when actually needed (skip the HBM round-trip otherwise).
    if (B_pad, D_pad) != (B, D):
        x_p = jnp.pad(x, ((0, B_pad - B), (0, D_pad - D)))
    else:
        x_p = x

    if mode == "auto":
        est = _fused_vmem_estimate(TB, D_pad, E_pad,
                                   jnp.dtype(x.dtype).itemsize,
                                   jnp.dtype(params["w1"].dtype).itemsize)
        mode = "fused" if est <= _FUSED_VMEM_BUDGET else "tiled"

    if mode == "fused":
        enc_p, dec_p = _forward_fused(x_p, params, TB)
    else:
        enc_p, dec_p = _forward_tiled(x_p, params, TB)

    enc = enc_p[:B, :E] if (B_pad, E_pad) != (B, E) else enc_p
    dec = dec_p[:B, :D] if (B_pad, D_pad) != (B, D) else dec_p
    return enc, dec


# -----------------------------------------------------------------------------
# Init + reference
# -----------------------------------------------------------------------------

def init_params(key, input_dim, encoding_dim, dtype=jnp.float32):
    """Deterministic init matching torch.nn.Linear's default:
    U(-1/sqrt(fan_in), 1/sqrt(fan_in)) for both weight and bias."""
    k1, k2, k3, k4 = jax.random.split(key, 4)

    bound1 = 1.0 / math.sqrt(input_dim)
    w1 = jax.random.uniform(k1, (input_dim, encoding_dim), dtype, -bound1, bound1)
    b1 = jax.random.uniform(k2, (encoding_dim,), dtype, -bound1, bound1)

    bound2 = 1.0 / math.sqrt(encoding_dim)
    w2 = jax.random.uniform(k3, (encoding_dim, input_dim), dtype, -bound2, bound2)
    b2 = jax.random.uniform(k4, (input_dim,), dtype, -bound2, bound2)
    return w1, b1, w2, b2


def reference_forward(x, w1, b1, w2, b2):
    """Pure-JAX f32 reference (highest matmul precision)."""
    enc = jnp.maximum(jnp.dot(x, w1, precision=jax.lax.Precision.HIGHEST) + b1, 0.0)
    dec = jnp.maximum(jnp.dot(enc, w2, precision=jax.lax.Precision.HIGHEST) + b2, 0.0)
    return enc, dec


if __name__ == "__main__":
    # Batch of TF-IDF-like feature rows; batch=256 with TB=128 gives a 2-step
    # parallel grid (both v7x TensorCores), D=512 stands in for the vocab size.
    batch = 256
    input_dim = 512      # stand-in for tfidf_matrix.shape[1]
    encoding_dim = 100   # as in the module (padded to 128 internally)

    key = jax.random.PRNGKey(0)
    kx, kp = jax.random.split(key)

    # Non-negative sparse-ish input, like TF-IDF features.
    x = jnp.maximum(jax.random.normal(kx, (batch, input_dim), jnp.float32), 0.0)
    w1, b1, w2, b2 = init_params(kp, input_dim, encoding_dim)

    # Weight padding + bf16 cast done ONCE, outside the per-call path.
    params = prepare_params(w1, b1, w2, b2)

    # Auto path (fused, weight-resident at these shapes).
    encoded, decoded = anime_autoencoder_forward(x, params)
    jax.block_until_ready((encoded, decoded))

    # Also exercise the D-tiled (large-vocab / v7x-safe) path with a small D tile.
    params_tiled = prepare_params(w1, b1, w2, b2, max_d_tile=128)
    enc_t, dec_t = anime_autoencoder_forward(x, params_tiled, mode="tiled")
    jax.block_until_ready((enc_t, dec_t))

    enc_ref, dec_ref = reference_forward(x, w1, b1, w2, b2)

    assert encoded.shape == (batch, encoding_dim)
    assert decoded.shape == (batch, input_dim)
    # bf16 MXU operands with f32 accumulation vs. an f32 HIGHEST reference:
    # tolerance is deliberately sized for bf16 rounding (observed error ~1e-3).
    for e, d in ((encoded, decoded), (enc_t, dec_t)):
        assert jnp.allclose(e, enc_ref, atol=2e-2, rtol=2e-2), \
            float(jnp.max(jnp.abs(e - enc_ref)))
        assert jnp.allclose(d, dec_ref, atol=2e-2, rtol=2e-2), \
            float(jnp.max(jnp.abs(d - dec_ref)))

    print("KERNEL_OK")
</pallas_src>

<mosaic_0001>
module attributes {stable_mosaic.version = 11 : i64} {
  func.func @_fused_kernel(%arg0: i32, %arg1: memref<128x512xf32, #tpu.memory_space<vmem>>, %arg2: memref<512x128xbf16, #tpu.memory_space<vmem>>, %arg3: memref<1x128xf32, #tpu.memory_space<vmem>>, %arg4: memref<128x512xbf16, #tpu.memory_space<vmem>>, %arg5: memref<1x512xf32, #tpu.memory_space<vmem>>, %arg6: memref<128x128xf32, #tpu.memory_space<vmem>>, %arg7: memref<128x512xf32, #tpu.memory_space<vmem>>) attributes {dimension_semantics = [#tpu.dimension_semantics<parallel>], iteration_bounds = array<i64: 2>, scalar_prefetch = 0 : i64, scratch_operands = 0 : i64, tpu.core_type = #tpu.core_type<tc>, window_params = [{transform_indices = @transform_0, window_bounds = array<i64: 128, 512>}, {pipeline_mode = #tpu.pipeline_mode<synchronous>, transform_indices = @transform_1, window_bounds = array<i64: 512, 128>}, {pipeline_mode = #tpu.pipeline_mode<synchronous>, transform_indices = @transform_2, window_bounds = array<i64: 1, 128>}, {pipeline_mode = #tpu.pipeline_mode<synchronous>, transform_indices = @transform_3, window_bounds = array<i64: 128, 512>}, {pipeline_mode = #tpu.pipeline_mode<synchronous>, transform_indices = @transform_4, window_bounds = array<i64: 1, 512>}, {transform_indices = @transform_5, window_bounds = array<i64: 128, 128>}, {transform_indices = @transform_6, window_bounds = array<i64: 128, 512>}]} {
    %c0 = arith.constant 0 : index
    %c0_0 = arith.constant 0 : index
    %0 = vector.load %arg1[%c0, %c0_0] : memref<128x512xf32, #tpu.memory_space<vmem>>, vector<128x512xf32>
    %1 = arith.truncf %0 : vector<128x512xf32> to vector<128x512xbf16>
    %c0_1 = arith.constant 0 : index
    %c0_2 = arith.constant 0 : index
    %2 = vector.load %arg2[%c0_1, %c0_2] : memref<512x128xbf16, #tpu.memory_space<vmem>>, vector<512x128xbf16>
    %cst = arith.constant dense<0.000000e+00> : vector<128x128xf32>
    %3 = tpu.matmul %1, %2, %cst {dimension_numbers = #tpu.dot_dimension_numbers<[1], [0], [0], [1], [0, 0, 1, 1], [], []>} : vector<128x512xbf16>, vector<512x128xbf16>, vector<128x128xf32> -> vector<128x128xf32>
    %c0_3 = arith.constant 0 : index
    %c0_4 = arith.constant 0 : index
    %4 = vector.load %arg3[%c0_3, %c0_4] : memref<1x128xf32, #tpu.memory_space<vmem>>, vector<1x128xf32>
    %5 = vector.broadcast %4 : vector<1x128xf32> to vector<128x128xf32>
    %6 = arith.addf %3, %5 : vector<128x128xf32>
    %cst_5 = arith.constant 0.000000e+00 : f32
    %7 = vector.broadcast %cst_5 : f32 to vector<128x128xf32>
    %8 = arith.maximumf %6, %7 : vector<128x128xf32>
    %c0_6 = arith.constant 0 : index
    %c0_7 = arith.constant 0 : index
    %9 = vector.load %arg6[%c0_6, %c0_7] : memref<128x128xf32, #tpu.memory_space<vmem>>, vector<128x128xf32>
    tpu.vector_store %arg6[%c0_6, %c0_7], %8 {strides = array<i32>} : memref<128x128xf32, #tpu.memory_space<vmem>>, vector<128x128xf32>,
    %10 = arith.truncf %8 : vector<128x128xf32> to vector<128x128xbf16>
    %c0_8 = arith.constant 0 : index
    %c0_9 = arith.constant 0 : index
    %11 = vector.load %arg4[%c0_8, %c0_9] : memref<128x512xbf16, #tpu.memory_space<vmem>>, vector<128x512xbf16>
    %cst_10 = arith.constant dense<0.000000e+00> : vector<128x512xf32>
    %12 = tpu.matmul %10, %11, %cst_10 {dimension_numbers = #tpu.dot_dimension_numbers<[1], [0], [0], [1], [0, 0, 1, 1], [], []>} : vector<128x128xbf16>, vector<128x512xbf16>, vector<128x512xf32> -> vector<128x512xf32>
    %c0_11 = arith.constant 0 : index
    %c0_12 = arith.constant 0 : index
    %13 = vector.load %arg5[%c0_11, %c0_12] : memref<1x512xf32, #tpu.memory_space<vmem>>, vector<1x512xf32>
    %14 = vector.broadcast %13 : vector<1x512xf32> to vector<128x512xf32>
    %15 = arith.addf %12, %14 : vector<128x512xf32>
    %cst_13 = arith.constant 0.000000e+00 : f32
    %16 = vector.broadcast %cst_13 : f32 to vector<128x512xf32>
    %17 = arith.maximumf %15, %16 : vector<128x512xf32>
    %c0_14 = arith.constant 0 : index
    %c0_15 = arith.constant 0 : index
    %18 = vector.load %arg7[%c0_14, %c0_15] : memref<128x512xf32, #tpu.memory_space<vmem>>, vector<128x512xf32>
    tpu.vector_store %arg7[%c0_14, %c0_15], %17 {strides = array<i32>} : memref<128x512xf32, #tpu.memory_space<vmem>>, vector<128x512xf32>,
    return
  }
  func.func @transform_0(%arg0: i32) -> (i32, i32) {
    %c0_i32 = arith.constant 0 : i32
    %c0_i32_0 = arith.constant 0 : i32
    return %arg0, %c0_i32 : i32, i32
  }
  func.func @transform_1(%arg0: i32) -> (i32, i32) {
    %c0_i32 = arith.constant 0 : i32
    %c0_i32_0 = arith.constant 0 : i32
    %c0_i32_1 = arith.constant 0 : i32
    return %c0_i32, %c0_i32_0 : i32, i32
  }
  func.func @transform_2(%arg0: i32) -> (i32, i32) {
    %c0_i32 = arith.constant 0 : i32
    %c0_i32_0 = arith.constant 0 : i32
    %c0_i32_1 = arith.constant 0 : i32
    return %c0_i32, %c0_i32_0 : i32, i32
  }
  func.func @transform_3(%arg0: i32) -> (i32, i32) {
    %c0_i32 = arith.constant 0 : i32
    %c0_i32_0 = arith.constant 0 : i32
    %c0_i32_1 = arith.constant 0 : i32
    return %c0_i32, %c0_i32_0 : i32, i32
  }
  func.func @transform_4(%arg0: i32) -> (i32, i32) {
    %c0_i32 = arith.constant 0 : i32
    %c0_i32_0 = arith.constant 0 : i32
    %c0_i32_1 = arith.constant 0 : i32
    return %c0_i32, %c0_i32_0 : i32, i32
  }
  func.func @transform_5(%arg0: i32) -> (i32, i32) {
    %c0_i32 = arith.constant 0 : i32
    %c0_i32_0 = arith.constant 0 : i32
    return %arg0, %c0_i32 : i32, i32
  }
  func.func @transform_6(%arg0: i32) -> (i32, i32) {
    %c0_i32 = arith.constant 0 : i32
    %c0_i32_0 = arith.constant 0 : i32
    return %arg0, %c0_i32 : i32, i32
  }
}

</mosaic_0001>

<bundles_post_ra>
// kernel: tpu_custom_call.1
= control target key start
LH: loop header
LB: loop body
LE: loop exit
PB: predicated region body
PF: predicated region fallthrough
CT: control target
= control target key end

     0   :  { %12 = vsyncpa [#allocation3], 0  ;;  %s2797_s0 = inlined_call_operand.hbm [shape: f32[256,512], index: 0, kind: input, shape index: {}]   ;;  %s2798_s1 = inlined_call_operand.hbm [shape: bf16[512,128], index: 1, kind: input, shape index: {}]   ;;  %s2799_s2 = inlined_call_operand.vmem [shape: f32[1,128], index: 2, kind: input, shape index: {}]   ;;  %s2800_s3 = inlined_call_operand.hbm [shape: bf16[128,512], index: 3, kind: input, shape index: {}]   ;;  %s2801_s4 = inlined_call_operand.vmem [shape: f32[1,512], index: 4, kind: input, shape index: {}]   ;;  %s2802_s5 = inlined_call_operand.hbm [shape: f32[256,128], index: 5, kind: output, shape index: {0}]   ;;  %s2803_s6 = inlined_call_operand.hbm [shape: f32[256,512], index: 6, kind: output, shape index: {1}]  }
   0x1   :  { %14 = vsyncpa [#allocation3 + $0x1], 0 }
   0x2   :  { %15 = vsyncpa [#allocation6], 0 }
   0x3   :  { %16 = vsyncpa [#allocation4], 0 }
   0x4   :  { %18 = vsyncpa [#allocation4 + $0x1], 0 }
   0x5   :  { %19 = vsyncpa [#allocation10], 0 }
   0x6   :  { %21 = vsyncpa [#allocation10 + $0x1], 0  ;;  %s2262_s21 = smov 0   ;;  %s2264_s22 = smov 0  }
   0x7   :  { %s2266_s23 = smov 0   ;;  %s2268_s24 = smov 0  }
   0x8 LB: > { %s2283_s25 = sadd.s32 4294967295, %s2209_s24   ;;  %s1636_s26 = sadd.s32 4294967294, %s2209_s24   ;;  %s2209_s24 = sphi %s2268_s24, %s2823_s24   ;;  %s2205_s23 = sphi %s2266_s23, %s2822_s23   ;;  %s2201_s22 = sphi %s2264_s22, %s2821_s22   ;;  %s2197_s21 = sphi %s2262_s21, %s2820_s21  }
   0x9   : > { %p47_p0 = scmp.ne.s32.totalorder %s2201_s22, %s2197_s21  ;;  %p2804_p1 = scmp.eq.s32.totalorder %s2283_s25, 0 }
   0xa   : > { %p161_p3 = scmp.eq.s32.totalorder %s1636_s26, 1  ;;  %p1637_p5 = scmp.ge.s32.totalorder %s2209_s24, 1 }
   0xb   : > { %p2292_p4 = por %p2804_p1, %p47_p0  ;;  %p194_p7 = scmp.lt.s32.totalorder %s2209_s24, 3 }
   0xc   : > { %p2297_p6 = por %p161_p3, %p47_p0  ;;  %s2211_s30 = smov [#allocation5]  }
   0xd   : > { %s2807_s27 = scalar_select %p2292_p4, 1, 0 }
   0xe   : > { %s2808_s28 = scalar_select %p2297_p6, 1, 0 }
   0xf   : > { %p2302_p8 = pnand %p1637_p5, %p194_p7  ;;  %s206_s7 = sshll.u32 %s2211_s30, 4  ;;  %s2306_s7 = int_to_ptr.vmem [resolvable:$true] %s206_s7 }
  0x10   : > { %s2212_s9 = smov [#allocation7]   ;;  %s2021_s13 = scalar_lea.hbm %s2798_s1, 4096 }
  0x11   : > { %p1872_p9 = pneg %p2302_p8  ;;  %s222_s10 = sshll.u32 %s2212_s9, 4  ;;  %s2317_s10 = int_to_ptr.vmem [resolvable:$true] %s222_s10 }
  0x12   : > { %p2022_p12 = scmp.ne.s32.totalorder %s2798_s1, %s2021_s13  ;;  %p2028_p5 = scmp.lt.u32.totalorder %s2021_s13, %s2798_s1 }
  0x13   : > { %p2313_p11 = pnand %p1872_p9, %p2804_p1 }
  0x15   : > { %p2023_p13 = pneg %p2313_p11 }
  0x17   : > { %p2024_p0 = pnand %p2023_p13, %p2022_p12 }
  0x19   : > { %p2025_p3 = pneg %p2024_p0 }
  0x1b   : > { %p2030_p7 = pnand %p2028_p5, %p2025_p3 }
  0x1d   : > { %2033 = shalt.err (!%p2030_p7)
}
  0x1e   : > { %s2034_s18 = scalar_lea.vmem %s2306_s7, 4096  ;;  %p2042_p2 = scmp.lt.s32.totalorder %s2306_s7, %s2306_s7 }
  0x1f   : > { %p2035_p9 = scmp.ne.s32.totalorder %s2306_s7, %s2034_s18  ;;  %p2043_p12 = scmp.lt.s32.totalorder %s2034_s18, %s2034_s18 }
  0x21   : > { %p2037_p10 = pnand %p2035_p9, %p2023_p13  ;;  %p2044_p0 = por %p2043_p12, %p2042_p2 }
  0x23   : > { %p2038_p1 = pneg %p2037_p10 }
  0x25   : > { %p2045_p6 = pnand %p2044_p0, %p2038_p1 }
  0x27   : > { %2048 = shalt.err (!%p2045_p6)
}
  0x28   : > { %s2213_s19 = smov 64   ;;  %s2214_s20 = smov 4  }
  0x29   : > { %1875 = dma.hbm_to_vmem [thread:$0]  (!%p2313_p11), %s2798_s1, 4096, %s2306_s7, [#allocation6], %s2213_s19, %s2213_s19, %s2214_s20  }
  0x2a   : > { %s2049_s12 = scalar_lea.hbm %s2800_s3, 4096 }
  0x2b   : > { %p2050_p2 = scmp.ne.s32.totalorder %s2800_s3, %s2049_s12  ;;  %p2056_p10 = scmp.lt.u32.totalorder %s2049_s12, %s2800_s3 }
  0x2d   : > { %p2052_p1 = pnand %p2050_p2, %p2023_p13 }
  0x2f   : > { %p2053_p6 = pneg %p2052_p1 }
  0x31   : > { %p2058_p3 = pnand %p2056_p10, %p2053_p6 }
  0x33   : > { %2061 = shalt.err (!%p2058_p3)
}
  0x34   : > { %s2062_s7 = scalar_lea.vmem %s2317_s10, 4096  ;;  %p2070_p12 = scmp.lt.s32.totalorder %s2317_s10, %s2317_s10 }
  0x35   : > { %p2063_p5 = scmp.ne.s32.totalorder %s2317_s10, %s2062_s7  ;;  %p2071_p0 = scmp.lt.s32.totalorder %s2062_s7, %s2062_s7 }
  0x37   : > { %p2065_p7 = pnand %p2063_p5, %p2023_p13  ;;  %p2072_p2 = por %p2071_p0, %p2070_p12 }
  0x39   : > { %p2066_p9 = pneg %p2065_p7 }
  0x3b   : > { %p2073_p1 = pnand %p2072_p2, %p2066_p9 }
  0x3d   : > { %2076 = shalt.err (!%p2073_p1)
}
  0x3e   : > { %s2215_s17 = smov 256   ;;  %s2216_s18 = smov 16  }
  0x3f   : > { %1878 = dma.hbm_to_vmem [thread:$0]  (!%p2313_p11), %s2800_s3, 4096, %s2317_s10, [#allocation6], %s2215_s17, %s2215_s17, %s2216_s18  }
  0x40   : > { %s2372_s26 = sadd.s32 1, %s2209_s24   ;;  %s34_s9 = sadd.s32 1, %s2205_s23 }
  0x41   : > { %s31_s30 = ssub.s32 %s2209_s24, %s2372_s26  ;;  %p41_p6 = scmp.ne.s32.totalorder %s2205_s23, %s2201_s22 }
  0x42   : > { %p32_p13 = scmp.eq.s32.totalorder %s31_s30, 0  ;;  %p42_p10 = scmp.eq.s32.totalorder %s2209_s24, 0 }
  0x43   : > { %p2811_p5 = scmp.eq.s32.totalorder %s2283_s25, 1  ;;  %p1892_p9 = scmp.lt.s32.totalorder %s2209_s24, 2 }
  0x44   : > { %s2381_s11 = scalar_select %p32_p13, %s2205_s23, %s34_s9  }
  0x45   : > { %p43_p3 = por %p42_p10, %p41_p6  ;;  %p2385_p7 = por %p2811_p5, %p41_p6 }
  0x46   : > { %s239_s8 = sand.u32 1, %s2205_s23   ;;  %s1726_s10 = sshll.u32 %s2209_s24, 13 }
  0x47   : > { %s2812_s12 = scalar_select %p2385_p7, 1, 0 }
  0x48   : > { %s1641_s13 = sshll.u32 %s239_s8, 9  ;;  %s2395_s16 = scalar_lea.hbm %s2797_s0, %s1726_s10 }
  0x49   : > { %s243_s7 = scalar_lea.vmem [#allocation2], %s1641_s13  ;;  %p2399_p11 = pnand %p1892_p9, %p43_p3 }
  0x4a   : > { %s251_s17 = sshll.u32 %s243_s7, 4  ;;  %s2403_s19 = scalar_lea.sflag [#allocation3], %s239_s8  ;;  %s2397_s17 = int_to_ptr.vmem [resolvable:$true] %s251_s17 }
  0x4b   : > { %s2077_s20 = scalar_lea.hbm %s2395_s16, 8192  ;;  %p2079_p0 = pneg %p2399_p11 }
  0x4c   : > { %p2078_p12 = scmp.ne.s32.totalorder %s2395_s16, %s2077_s20  ;;  %s2082_s13 = scalar_lea.hbm %s2797_s0, 16384 }
  0x4d   : > { %p2083_p13 = scmp.lt.u32.totalorder %s2395_s16, %s2797_s0  ;;  %p2084_p6 = scmp.lt.u32.totalorder %s2082_s13, %s2077_s20 }
  0x4e   : > { %p2080_p2 = pnand %p2079_p0, %p2078_p12  ;;  %p2086_p3 = scmp.lt.u32.totalorder %s2077_s20, %s2395_s16 }
  0x4f   : > { %p2085_p10 = por %p2084_p6, %p2083_p13 }
  0x50   : > { %p2081_p1 = pneg %p2080_p2 }
  0x51   : > { %p2087_p5 = por %p2086_p3, %p2085_p10 }
  0x53   : > { %p2088_p9 = pnand %p2087_p5, %p2081_p1 }
  0x55   : > { %2091 = shalt.err (!%p2088_p9)
}
  0x56   : > { %s2092_s8 = scalar_lea.vmem %s2397_s17, 8192  ;;  %s2217_s15 = smov [#allocation2]  }
  0x57   : > { %p2093_p12 = scmp.ne.s32.totalorder %s2397_s17, %s2092_s8  ;;  %s2097_s7 = sshll.u32 %s2217_s15, 4  ;;  %s2098_s7 = int_to_ptr.vmem [resolvable:$false] %s2097_s7 }
  0x58   : > { %s2099_s30 = scalar_lea.vmem %s2098_s7, 16384  ;;  %p2100_p4 = scmp.lt.s32.totalorder %s2397_s17, %s2098_s7 }
  0x59   : > { %p2095_p2 = pnand %p2093_p12, %p2079_p0  ;;  %p2101_p13 = scmp.lt.s32.totalorder %s2099_s30, %s2092_s8 }
  0x5b   : > { %p2096_p7 = pneg %p2095_p2  ;;  %p2102_p6 = por %p2101_p13, %p2100_p4 }
  0x5d   : > { %p2103_p10 = pnand %p2102_p6, %p2096_p7 }
  0x5f   : > { %2106 = shalt.err (!%p2103_p10)
}
  0x60   : > { %s2218_s20 = smov 512   ;;  %s2219_s9 = smov 32  }
  0x61   : > { %1882 = dma.hbm_to_vmem [thread:$0]  (!%p2399_p11), %s2395_s16, 8192, %s2397_s17, %s2403_s19, %s2218_s20, %s2218_s20, %s2219_s9  }
  0x62   : > { %263 = sbr.rel (%p2302_p8) target bundleno = 658 (0x292), region = 40  ;;  %s2434_s13 = sand.u32 (!%p2302_p8), 1, %s2201_s22  }
  0x63   : > { %s1646_s10 = sshll.u32 (!%p2302_p8), %s2434_s13, 9  ;;  %s266_s14 = scalar_lea.sflag (!%p2302_p8), [#allocation3], %s2434_s13 }
  0x64   : > { %s2440_s8 = scalar_lea.vmem (!%p2302_p8), [#allocation2], %s1646_s10  ;;  %p2814_p4 = scmp.ne.s32.totalorder (!%p2302_p8), %s2807_s27, 0 }
  0x69   : > { %2180 = dma.done.wait (%p2814_p4), %s266_s14, 8192  }
  0x6a   : > { %2182 = vsyncadd (%p2814_p4), %s266_s14, 4294959104  ;;  %p2815_p7 = scmp.eq.s32.totalorder %s2283_s25, 0 }
  0x6c   : > { %2184 = dma.done.wait (%p2815_p7), [#allocation6], 8192   ;;  %p2816_p8 = pmov %p2815_p7 }
  0x6d   : > { %v1941_v0 = vld [vmem:[#allocation5 + $0x40] sm:$0xff]   ;;  %v1945_v4 = vld [vmem:[#allocation5 + $0x48] sm:$0xff]   ;;  %v1949_v8 = vld [vmem:[#allocation5 + $0x50] sm:$0xff]   ;;  %s1649_s16 = sshll.u32 %s2434_s13, 7  ;;  %s1727_s18 = sshll.u32 %s2283_s25, 11 }
  0x6e   : > { %2186 = vsyncadd (%p2816_p8), [#allocation6], 4294959104  ;;  %v1942_v1 = vld [vmem:[#allocation5 + $0xc0] sm:$0xff]   ;;  %1730 = vmatprep.subr.bf16.mxu0 %v1941_v0  ;;  %v1946_v5 = vld [vmem:[#allocation5 + $0xc8] sm:$0xff]   ;;  %s2524_s17 = scalar_lea.vmem [#allocation8], %s1649_s16  ;;  %s2574_s7 = scalar_lea.hbm %s2802_s5, %s1727_s18 }
  0x6f   : > { %v1943_v2 = vld [vmem:[#allocation5] sm:$0xff]   ;;  %1794 = vmatprep.subr.bf16.mxu1 %v1942_v1  ;;  %v1947_v6 = vld [vmem:[#allocation5 + $0x8] sm:$0xff]   ;;  %v1950_v9 = vld [vmem:[#allocation5 + $0xd0] sm:$0xff]   ;;  %s1495_s30 = sshll.u32 %s2524_s17, 4  ;;  %s1477_s20 = scalar_lea.sflag [#allocation4], %s2434_s13  ;;  %s2577_s30 = int_to_ptr.vmem [resolvable:$true] %s1495_s30 }
  0x70   : > { %v1944_v3 = vld [vmem:[#allocation5 + $0x80] sm:$0xff]   ;;  %1731 = vmatpush3.bf16.msra.mxu0 %v1943_v2  ;;  %v1948_v7 = vld [vmem:[#allocation5 + $0x88] sm:$0xff]   ;;  %v1951_v10 = vld [vmem:[#allocation5 + $0x10] sm:$0xff]   ;;  %s2107_s9 = scalar_lea.vmem %s2577_s30, 2048  ;;  %p2817_p0 = scmp.ne.s32.totalorder %s2812_s12, 0 }
  0x71   : > { %1795 = vmatpush3.bf16.msra.mxu1 %v1944_v3  ;;  %1732 = vmatprep.subr.bf16.mxu0 %v1945_v4  ;;  %v1952_v11 = vld [vmem:[#allocation5 + $0x90] sm:$0xff]   ;;  %v1953_v12 = vld [vmem:[#allocation5 + $0x58] sm:$0xff]   ;;  %v1957_v16 = vld [vmem:[#allocation5 + $0x60] sm:$0xff]   ;;  %p2108_p11 = scmp.ne.s32.totalorder %s2577_s30, %s2107_s9  ;;  %s2221_s14 = smov [#allocation8]  }
  0x72   : > { %1796 = vmatprep.subr.bf16.mxu1 %v1946_v5  ;;  %v1954_v13 = vld [vmem:[#allocation5 + $0xd8] sm:$0xff]   ;;  %v1958_v17 = vld [vmem:[#allocation5 + $0xe0] sm:$0xff]   ;;  %v1961_v20 = vld [vmem:[#allocation5 + $0x68] sm:$0xff]  }
  0x73   : > { %v1955_v14 = vld [vmem:[#allocation5 + $0x18] sm:$0xff]   ;;  %v1959_v18 = vld [vmem:[#allocation5 + $0x20] sm:$0xff]   ;;  %v1962_v21 = vld [vmem:[#allocation5 + $0xe8] sm:$0xff]   ;;  %p2109_p1 = pnand %p2108_p11, %p2817_p0 }
  0x74   : > { %1733 = vmatpush3.bf16.msra.mxu0 %v1947_v6  ;;  %v1956_v15 = vld [vmem:[#allocation5 + $0x98] sm:$0xff]   ;;  %v1960_v19 = vld [vmem:[#allocation5 + $0xa0] sm:$0xff]   ;;  %v1963_v22 = vld [vmem:[#allocation5 + $0x28] sm:$0xff]  }
  0x75   : > { %1797 = vmatpush3.bf16.msra.mxu1 %v1948_v7  ;;  %1734 = vmatprep.subr.bf16.mxu0 %v1949_v8  ;;  %v1964_v23 = vld [vmem:[#allocation5 + $0xa8] sm:$0xff]   ;;  %v1965_v24 = vld [vmem:[#allocation5 + $0x70] sm:$0xff]   ;;  %v1969_v28 = vld [vmem:[#allocation5 + $0x78] sm:$0xff]   ;;  %p2110_p3 = pneg %p2109_p1 }
  0x76   : > { %1798 = vmatprep.subr.bf16.mxu1 %v1950_v9  ;;  %v1966_v25 = vld [vmem:[#allocation5 + $0xf0] sm:$0xff]   ;;  %v1970_v29 = vld [vmem:[#allocation5 + $0xf8] sm:$0xff]   ;;  %v316_v32 = vld [vmem:[%s2440_s8 + $0x8] sm:$0xff] }
  0x77   : > { %v1967_v26 = vld [vmem:[#allocation5 + $0x30] sm:$0xff]   ;;  %v1971_v30 = vld [vmem:[#allocation5 + $0x38] sm:$0xff]   ;;  %v320_v33 = vld [vmem:[%s2440_s8 + $0x28] sm:$0xff] }
  0x78   : > { %1735 = vmatpush3.bf16.msra.mxu0 %v1951_v10  ;;  %v1968_v27 = vld [vmem:[#allocation5 + $0xb0] sm:$0xff]   ;;  %v1972_v31 = vld [vmem:[#allocation5 + $0xb8] sm:$0xff]   ;;  %v380_v35 = vpack.c.bf16 %v320_v33, %v316_v32  ;;  %v315_v37 = vld [vmem:[%s2440_s8] sm:$0xff] }
  0x79   : > { %1799 = vmatpush3.bf16.msra.mxu1 %v1952_v11  ;;  %1736 = vmatprep.subr.bf16.mxu0 %v1953_v12  ;;  %v318_v34 = vld [vmem:[%s2440_s8 + $0x18] sm:$0xff]  ;;  %v319_v38 = vld [vmem:[%s2440_s8 + $0x20] sm:$0xff]  ;;  %v317_v41 = vld [vmem:[%s2440_s8 + $0x10] sm:$0xff] }
  0x7a   : > { %1800 = vmatprep.subr.bf16.mxu1 %v1954_v13  ;;  %v322_v36 = vld [vmem:[%s2440_s8 + $0x38] sm:$0xff]  ;;  %v379_v40 = vpack.c.bf16 %v319_v38, %v315_v37  ;;  %v321_v42 = vld [vmem:[%s2440_s8 + $0x30] sm:$0xff]  ;;  %v324_v43 = vld [vmem:[%s2440_s8 + $0x48] sm:$0xff]  ;;  %706 = vmatprep.mubr.bf16.mxu0 %v380_v35 }
  0x7b   : > { %v382_v39 = vpack.c.bf16 %v322_v36, %v318_v34  ;;  %v381_v44 = vpack.c.bf16 %v321_v42, %v317_v41  ;;  %v328_v45 = vld [vmem:[%s2440_s8 + $0x68] sm:$0xff]  ;;  %v326_v46 = vld [vmem:[%s2440_s8 + $0x58] sm:$0xff]  ;;  %v323_v50 = vld [vmem:[%s2440_s8 + $0x40] sm:$0xff] }
  0x7c   : > { %1737 = vmatpush3.bf16.msra.mxu0 %v1955_v14  ;;  %v330_v47 = vld [vmem:[%s2440_s8 + $0x78] sm:$0xff]  ;;  %v384_v48 = vpack.c.bf16 %v328_v45, %v324_v43  ;;  %v327_v51 = vld [vmem:[%s2440_s8 + $0x60] sm:$0xff]  ;;  %v325_v52 = vld [vmem:[%s2440_s8 + $0x50] sm:$0xff] }
  0x7d   : > { %1801 = vmatpush3.bf16.msra.mxu1 %v1956_v15  ;;  %1738 = vmatprep.subr.bf16.mxu0 %v1957_v16  ;;  %v386_v49 = vpack.c.bf16 %v330_v47, %v326_v46  ;;  %v329_v53 = vld [vmem:[%s2440_s8 + $0x70] sm:$0xff]  ;;  %v332_v54 = vld [vmem:[%s2440_s8 + $0x88] sm:$0xff]  ;;  %v334_v56 = vld [vmem:[%s2440_s8 + $0x98] sm:$0xff]  ;;  %v383_v58 = vpack.c.bf16 %v327_v51, %v323_v50 }
  0x7e   : > { %1802 = vmatprep.subr.bf16.mxu1 %v1958_v17  ;;  %803 = vmatprep.mubr.bf16.mxu1 %v382_v39  ;;  %v336_v55 = vld [vmem:[%s2440_s8 + $0xa8] sm:$0xff]  ;;  %v338_v57 = vld [vmem:[%s2440_s8 + $0xb8] sm:$0xff]  ;;  %v385_v59 = vpack.c.bf16 %v329_v53, %v325_v52  ;;  %v331_v62 = vld [vmem:[%s2440_s8 + $0x80] sm:$0xff] }
  0x7f   : > { %v388_v60 = vpack.c.bf16 %v336_v55, %v332_v54  ;;  %v390_v61 = vpack.c.bf16 %v338_v57, %v334_v56  ;;  %v335_v63 = vld [vmem:[%s2440_s8 + $0xa0] sm:$0xff]  ;;  %v333_v0 = vld [vmem:[%s2440_s8 + $0x90] sm:$0xff]  ;;  %v340_v2 = vld [vmem:[%s2440_s8 + $0xc8] sm:$0xff] }
  0x80   : > { %1739 = vmatpush3.bf16.msra.mxu0 %v1959_v18  ;;  %v337_v1 = vld [vmem:[%s2440_s8 + $0xb0] sm:$0xff]  ;;  %v344_v3 = vld [vmem:[%s2440_s8 + $0xe8] sm:$0xff]  ;;  %v342_v4 = vld [vmem:[%s2440_s8 + $0xd8] sm:$0xff]  ;;  %v387_v6 = vpack.c.bf16 %v335_v63, %v331_v62 }
  0x81   : > { %1803 = vmatpush3.bf16.msra.mxu1 %v1960_v19  ;;  %1740 = vmatprep.subr.bf16.mxu0 %v1961_v20  ;;  %v346_v5 = vld [vmem:[%s2440_s8 + $0xf8] sm:$0xff]  ;;  %v389_v7 = vpack.c.bf16 %v337_v1, %v333_v0  ;;  %v392_v8 = vpack.c.bf16 %v344_v3, %v340_v2  ;;  %v339_v10 = vld [vmem:[%s2440_s8 + $0xc0] sm:$0xff]  ;;  %v341_v12 = vld [vmem:[%s2440_s8 + $0xd0] sm:$0xff] }
  0x82   : > { %1804 = vmatprep.subr.bf16.mxu1 %v1962_v21  ;;  %v394_v9 = vpack.c.bf16 %v346_v5, %v342_v4  ;;  %v343_v11 = vld [vmem:[%s2440_s8 + $0xe0] sm:$0xff]  ;;  %v345_v13 = vld [vmem:[%s2440_s8 + $0xf0] sm:$0xff]  ;;  %v348_v14 = vld [vmem:[%s2440_s8 + $0x108] sm:$0xff] }
  0x83   : > { %v352_v15 = vld [vmem:[%s2440_s8 + $0x128] sm:$0xff]  ;;  %v350_v16 = vld [vmem:[%s2440_s8 + $0x118] sm:$0xff]  ;;  %v1973_v18 = vld [vmem:[#allocation7] ss:$16 sps:$4 sm:$0xff]  }
  0x84   : > { %1741 = vmatpush3.bf16.msra.mxu0 %v1963_v22  ;;  %v354_v17 = vld [vmem:[%s2440_s8 + $0x138] sm:$0xff]  ;;  %v1975_v19 = vld [vmem:[#allocation7 + $0x4] ss:$16 sps:$4 sm:$0xff]   ;;  %v391_v22 = vpack.c.bf16 %v343_v11, %v339_v10  ;;  %v356_v35 = vld [vmem:[%s2440_s8 + $0x148] sm:$0xff] }
  0x85   : > { %1805 = vmatpush3.bf16.msra.mxu1 %v1964_v23  ;;  %1742 = vmatprep.subr.bf16.mxu0 %v1965_v24  ;;  %v1976_v20 = vld [vmem:[#allocation7 + $0x8] ss:$16 sps:$4 sm:$0xff]   ;;  %v1978_v21 = vld [vmem:[#allocation7 + $0xc] ss:$16 sps:$4 sm:$0xff]   ;;  %v393_v23 = vpack.c.bf16 %v345_v13, %v341_v12  ;;  %v396_v24 = vpack.c.bf16 %v352_v15, %v348_v14  ;;  %v1987_v32 = vld [vmem:[#allocation7 + $0x44] ss:$16 sps:$4 sm:$0xff]  }
  0x86   : > { %1806 = vmatprep.subr.bf16.mxu1 %v1966_v25  ;;  %v1981_v25 = vld [vmem:[#allocation7 + $0x24] ss:$16 sps:$4 sm:$0xff]   ;;  %v360_v36 = vld [vmem:[%s2440_s8 + $0x168] sm:$0xff]  ;;  %v358_v37 = vld [vmem:[%s2440_s8 + $0x158] sm:$0xff] }
  0x87   : > { %v349_v33 = vld [vmem:[%s2440_s8 + $0x110] sm:$0xff]  ;;  %v1990_v38 = vld [vmem:[#allocation7 + $0x4c] ss:$16 sps:$4 sm:$0xff]   ;;  %v1988_v41 = vld [vmem:[#allocation7 + $0x48] ss:$16 sps:$4 sm:$0xff]   ;;  %v400_v46 = vpack.c.bf16 %v360_v36, %v356_v35 }
  0x88   : > { %1743 = vmatpush3.bf16.msra.mxu0 %v1967_v26  ;;  %v398_v26 = vpack.c.bf16 %v354_v17, %v350_v16  ;;  %v353_v34 = vld [vmem:[%s2440_s8 + $0x130] sm:$0xff]  ;;  %v362_v39 = vld [vmem:[%s2440_s8 + $0x178] sm:$0xff]  ;;  %v359_v50 = vld [vmem:[%s2440_s8 + $0x160] sm:$0xff] }
  0x89   : > { %1807 = vmatpush3.bf16.msra.mxu1 %v1968_v27  ;;  %1744 = vmatprep.subr.bf16.mxu0 %v1969_v28  ;;  %v1979_v27 = vld [vmem:[#allocation7 + $0x20] ss:$16 sps:$4 sm:$0xff]   ;;  %v1984_v28 = vld [vmem:[#allocation7 + $0x2c] ss:$16 sps:$4 sm:$0xff]   ;;  %v1993_v42 = vld [vmem:[#allocation7 + $0x64] ss:$16 sps:$4 sm:$0xff]   ;;  %v397_v45 = vpack.c.bf16 %v353_v34, %v349_v33  ;;  %v402_v47 = vpack.c.bf16 %v362_v39, %v358_v37 }
  0x8a   : > { %1808 = vmatprep.subr.bf16.mxu1 %v1970_v29  ;;  %v347_v29 = vld [vmem:[%s2440_s8 + $0x100] sm:$0xff]  ;;  %v1994_v51 = vld [vmem:[#allocation7 + $0x68] ss:$16 sps:$4 sm:$0xff]   ;;  %v357_v53 = vld [vmem:[%s2440_s8 + $0x150] sm:$0xff] }
  0x8b   : > { %v1999_v52 = vld [vmem:[#allocation7 + $0x84] ss:$16 sps:$4 sm:$0xff]   ;;  %v364_v55 = vld [vmem:[%s2440_s8 + $0x188] sm:$0xff]  ;;  %v2003_v4 = vld [vmem:[#allocation7 + $0xa0] ss:$16 sps:$4 sm:$0xff]  }
  0x8c   : > { %1745 = vmatpush3.bf16.msra.mxu0 %v1971_v30  ;;  %v351_v30 = vld [vmem:[%s2440_s8 + $0x120] sm:$0xff]  ;;  %v361_v54 = vld [vmem:[%s2440_s8 + $0x170] sm:$0xff]  ;;  %v368_v56 = vld [vmem:[%s2440_s8 + $0x1a8] sm:$0xff] }
  0x8d   : > { %1809 = vmatpush3.bf16.msra.mxu1 %v1972_v31  ;;  %1122 = vmatprep.subr.bf16.mxu0 %v1975_v19  ;;  %v1982_v31 = vld [vmem:[#allocation7 + $0x28] ss:$16 sps:$4 sm:$0xff]   ;;  %v395_v43 = vpack.c.bf16 %v351_v30, %v347_v29  ;;  %v2002_v57 = vld [vmem:[#allocation7 + $0x8c] ss:$16 sps:$4 sm:$0xff]   ;;  %v2005_v62 = vld [vmem:[#allocation7 + $0xa4] ss:$16 sps:$4 sm:$0xff]   ;;  %v401_v1 = vpack.c.bf16 %v361_v54, %v357_v53  ;;  %v404_v2 = vpack.c.bf16 %v368_v56, %v364_v55 }
  0x8e   : > { %1235 = vmatprep.subr.bf16.mxu1 %v1978_v21  ;;  %v2008_v63 = vld [vmem:[#allocation7 + $0xac] ss:$16 sps:$4 sm:$0xff]   ;;  %v2006_v5 = vld [vmem:[#allocation7 + $0xa8] ss:$16 sps:$4 sm:$0xff]   ;;  %v365_v10 = vld [vmem:[%s2440_s8 + $0x190] sm:$0xff] }
  0x8f   : > { %707 = vmatmul.mubr.bf16.vlgmr.msra.gmra.mrb[0].mxu0 %v379_v40  ;;  %v1985_v40 = vld [vmem:[#allocation7 + $0x40] ss:$16 sps:$4 sm:$0xff]   ;;  %v372_v12 = vld [vmem:[%s2440_s8 + $0x1c8] sm:$0xff]  ;;  %v374_v15 = vld [vmem:[%s2440_s8 + $0x1d8] sm:$0xff] }
  0x90   : > { %804 = vmatmul.mubr.bf16.vlgmr.msra.gmra.mrb[0].mxu1 %v381_v44  ;;  %714 = vmatprep.mubr.bf16.mxu0 %v384_v48  ;;  %v1996_v44 = vld [vmem:[#allocation7 + $0x6c] ss:$16 sps:$4 sm:$0xff]   ;;  %v1991_v48 = vld [vmem:[#allocation7 + $0x60] ss:$16 sps:$4 sm:$0xff]   ;;  %v2012_v17 = vld [vmem:[#allocation7 + $0xc8] ss:$16 sps:$4 sm:$0xff]  }
  0x91   : > { %811 = vmatprep.mubr.bf16.mxu1 %v386_v49  ;;  %1123 = vmatpush1.bf16.msra.mxu0 %v1973_v18  ;;  %v355_v49 = vld [vmem:[%s2440_s8 + $0x140] sm:$0xff]  ;;  %v369_v11 = vld [vmem:[%s2440_s8 + $0x1b0] sm:$0xff]  ;;  %v376_v13 = vld [vmem:[%s2440_s8 + $0x1e8] sm:$0xff] }
  0x92   : > { %1236 = vmatpush1.bf16.msra.mxu1 %v1976_v20  ;;  %1124 = vmatprep.subr.bf16.mxu0 %v1981_v25  ;;  %v399_v0 = vpack.c.bf16 %v359_v50, %v355_v49  ;;  %v2009_v14 = vld [vmem:[#allocation7 + $0xc0] ss:$16 sps:$4 sm:$0xff]   ;;  %v378_v16 = vld [vmem:[%s2440_s8 + $0x1f8] sm:$0xff]  ;;  %v405_v19 = vpack.c.bf16 %v369_v11, %v365_v10  ;;  %v408_v20 = vpack.c.bf16 %v376_v13, %v372_v12 }
  0x93   : > { %1237 = vmatprep.subr.bf16.mxu1 %v1984_v28  ;;  %v410_v21 = vpack.c.bf16 %v378_v16, %v374_v15  ;;  %v377_v25 = vld [vmem:[%s2440_s8 + $0x1f0] sm:$0xff]  ;;  %v2020_v29 = vld [vmem:[#allocation7 + $0xec] ss:$16 sps:$4 sm:$0xff]   ;;  %v2519_v35 = vld [vmem:[%s2799_s2] ss:$0 sm:$0xff] }
  0x94   : > { %v2017_v28 = vld [vmem:[#allocation7 + $0xe4] ss:$16 sps:$4 sm:$0xff]   ;;  %v2015_v30 = vld [vmem:[#allocation7 + $0xe0] ss:$16 sps:$4 sm:$0xff]  }
  0x95   : > { %1125 = vmatpush1.bf16.msra.mxu0 %v1979_v27 }
  0x96   : > { %1238 = vmatpush1.bf16.msra.mxu1 %v1982_v31  ;;  %1126 = vmatprep.subr.bf16.mxu0 %v1987_v32  ;;  %v2018_v31 = vld [vmem:[#allocation7 + $0xe8] ss:$16 sps:$4 sm:$0xff]   ;;  %v2220_v32 = vmov 0  }
  0x97   : > { %715 = vmatmul.mubr.bf16.gmra.mrb[4].mxu0 %v383_v58  ;;  %1239 = vmatprep.subr.bf16.mxu1 %v1990_v38  ;;  %v366_v58 = vld [vmem:[%s2440_s8 + $0x198] sm:$0xff] }
  0x98   : > { %812 = vmatmul.mubr.bf16.gmra.mrb[4].mxu1 %v385_v59  ;;  %722 = vmatprep.mubr.bf16.mxu0 %v388_v60  ;;  %v370_v59 = vld [vmem:[%s2440_s8 + $0x1b8] sm:$0xff]  ;;  %v1997_v60 = vld [vmem:[#allocation7 + $0x80] ss:$16 sps:$4 sm:$0xff]  }
  0x99   : > { %819 = vmatprep.mubr.bf16.mxu1 %v390_v61  ;;  %1127 = vmatpush1.bf16.msra.mxu0 %v1985_v40  ;;  %v2000_v61 = vld [vmem:[#allocation7 + $0x88] ss:$16 sps:$4 sm:$0xff]   ;;  %v406_v3 = vpack.c.bf16 %v370_v59, %v366_v58 }
  0x9a   : > { %1240 = vmatpush1.bf16.msra.mxu1 %v1988_v41  ;;  %1128 = vmatprep.subr.bf16.mxu0 %v1993_v42 }
  0x9b   : > { %1241 = vmatprep.subr.bf16.mxu1 %v1996_v44 }
  0x9d   : > { %1129 = vmatpush1.bf16.msra.mxu0 %v1991_v48 }
  0x9e   : > { %1242 = vmatpush1.bf16.msra.mxu1 %v1994_v51  ;;  %1130 = vmatprep.subr.bf16.mxu0 %v1999_v52 }
  0x9f   : > { %723 = vmatmul.mubr.bf16.gmra.mrb[8].mxu0 %v387_v6  ;;  %1243 = vmatprep.subr.bf16.mxu1 %v2002_v57  ;;  %v2011_v6 = vld [vmem:[#allocation7 + $0xc4] ss:$16 sps:$4 sm:$0xff]  }
  0xa0   : > { %820 = vmatmul.mubr.bf16.gmra.mrb[8].mxu1 %v389_v7  ;;  %730 = vmatprep.mubr.bf16.mxu0 %v392_v8  ;;  %v363_v7 = vld [vmem:[%s2440_s8 + $0x180] sm:$0xff]  ;;  %v2014_v8 = vld [vmem:[#allocation7 + $0xcc] ss:$16 sps:$4 sm:$0xff]  }
  0xa1   : > { %827 = vmatprep.mubr.bf16.mxu1 %v394_v9  ;;  %1131 = vmatpush1.bf16.msra.mxu0 %v1997_v60  ;;  %v367_v9 = vld [vmem:[%s2440_s8 + $0x1a0] sm:$0xff] }
  0xa2   : > { %1244 = vmatpush1.bf16.msra.mxu1 %v2000_v61  ;;  %1132 = vmatprep.subr.bf16.mxu0 %v2005_v62  ;;  %v403_v18 = vpack.c.bf16 %v367_v9, %v363_v7 }
  0xa3   : > { %1245 = vmatprep.subr.bf16.mxu1 %v2008_v63 }
  0xa5   : > { %1133 = vmatpush1.bf16.msra.mxu0 %v2003_v4 }
  0xa6   : > { %1246 = vmatpush1.bf16.msra.mxu1 %v2006_v5  ;;  %1134 = vmatprep.subr.bf16.mxu0 %v2011_v6 }
  0xa7   : > { %731 = vmatmul.mubr.bf16.gmra.mrb[12].mxu0 %v391_v22  ;;  %1247 = vmatprep.subr.bf16.mxu1 %v2014_v8  ;;  %v371_v22 = vld [vmem:[%s2440_s8 + $0x1c0] sm:$0xff] }
  0xa8   : > { %828 = vmatmul.mubr.bf16.gmra.mrb[12].mxu1 %v393_v23  ;;  %738 = vmatprep.mubr.bf16.mxu0 %v396_v24  ;;  %v375_v23 = vld [vmem:[%s2440_s8 + $0x1e0] sm:$0xff]  ;;  %v373_v24 = vld [vmem:[%s2440_s8 + $0x1d0] sm:$0xff]  ;;  %s2111_s8 = sshll.u32 %s2221_s14, 4  ;;  %s2112_s8 = int_to_ptr.vmem [resolvable:$false] %s2111_s8 }
  0xa9   : > { %835 = vmatprep.mubr.bf16.mxu1 %v398_v26  ;;  %1135 = vmatpush1.bf16.msra.mxu0 %v2009_v14  ;;  %v407_v26 = vpack.c.bf16 %v375_v23, %v371_v22  ;;  %v409_v27 = vpack.c.bf16 %v377_v25, %v373_v24  ;;  %s2113_s27 = scalar_lea.vmem %s2112_s8, 4096  ;;  %p2114_p5 = scmp.lt.s32.totalorder %s2577_s30, %s2112_s8 }
  0xaa   : > { %1248 = vmatpush1.bf16.msra.mxu1 %v2012_v17  ;;  %1136 = vmatprep.subr.bf16.mxu0 %v2017_v28  ;;  %p2115_p9 = scmp.lt.s32.totalorder %s2113_s27, %s2107_s9 }
  0xab   : > { %1249 = vmatprep.subr.bf16.mxu1 %v2020_v29 }
  0xac   : > { %p2116_p12 = por %p2115_p9, %p2114_p5 }
  0xad   : > { %1137 = vmatpush1.bf16.msra.mxu0 %v2015_v30 }
  0xae   : > { %1250 = vmatpush1.bf16.msra.mxu1 %v2018_v31  ;;  %p2117_p2 = pnand %p2116_p12, %p2110_p3 }
  0xaf   : > { %739 = vmatmul.mubr.bf16.gmra.mrb[16].mxu0 %v395_v43 }
  0xb0   : > { %836 = vmatmul.mubr.bf16.gmra.mrb[16].mxu1 %v397_v45  ;;  %746 = vmatprep.mubr.bf16.mxu0 %v400_v46 }
  0xb1   : > { %843 = vmatprep.mubr.bf16.mxu1 %v402_v47 }
  0xb7   : > { %747 = vmatmul.mubr.bf16.gmra.mrb[20].mxu0 %v399_v0 }
  0xb8   : > { %844 = vmatmul.mubr.bf16.gmra.mrb[20].mxu1 %v401_v1  ;;  %754 = vmatprep.mubr.bf16.mxu0 %v404_v2 }
  0xb9   : > { %851 = vmatprep.mubr.bf16.mxu1 %v406_v3 }
  0xbf   : > { %755 = vmatmul.mubr.bf16.gmra.mrb[24].mxu0 %v403_v18 }
  0xc0   : > { %852 = vmatmul.mubr.bf16.gmra.mrb[24].mxu1 %v405_v19  ;;  %762 = vmatprep.mubr.bf16.mxu0 %v408_v20 }
  0xc1   : > { %859 = vmatprep.mubr.bf16.mxu1 %v410_v21 }
  0xc7   : > { %763 = vmatmul.mubr.bf16.gmra.mrb[28].mxu0 %v407_v26 }
  0xc8   : > { %860 = vmatmul.mubr.bf16.gmra.mrb[28].mxu1 %v409_v27  ;;  %1154 = vmatprep.mubr.bf16.mxu0 %v2220_v32 }
  0xc9   : > { %1267 = vmatprep.mubr.bf16.mxu1 %v2220_v32 }
 0x162   : > { %v1746_v33 = vpop.f32.mrb[0].mxu0 }
 0x163   : > { %v1810_v34 = vpop.f32.mrb[0].mxu1  ;;  %v1747_v36 = vpop.f32.mrb[1].mxu0 }
 0x164   : > { %v1748_v37 = vadd.f32 %v1747_v36, %v1746_v33  ;;  %v1811_v38 = vpop.f32.mrb[1].mxu1  ;;  %v1749_v39 = vpop.f32.mrb[2].mxu0 }
 0x165   : > { %v1812_v40 = vadd.f32 %v1811_v38, %v1810_v34  ;;  %v1813_v41 = vpop.f32.mrb[2].mxu1  ;;  %v1750_v42 = vpop.f32.mrb[3].mxu0 }
 0x166   : > { %v709_v43 = vadd.f32 %v1748_v37, %v2519_v35  ;;  %v1751_v44 = vadd.f32 %v1750_v42, %v1749_v39  ;;  %v1814_v45 = vpop.f32.mrb[3].mxu1 }
 0x167   : > { %v1815_v46 = vadd.f32 %v1814_v45, %v1813_v41 }
 0x168   : > { %v806_v47 = vadd.f32 %v1812_v40, %v709_v43  ;;  %v712_v48 = vadd.f32 %v1751_v44, %v2519_v35 }
 0x16a   : > { %v868_v49 = vmax.f32 %v806_v47, 0.0  ;;  %v809_v50 = vadd.f32 %v1815_v46, %v712_v48  ;;  %v1752_v51 = vpop.f32.mrb[4].mxu0 }
 0x16b   : > { %v1816_v52 = vpop.f32.mrb[4].mxu1  ;;  %v1753_v53 = vpop.f32.mrb[5].mxu0 }
 0x16c   : > { %884 = vst [vmem:[%s2524_s17] sm:$0xff] %v868_v49  ;;  %v869_v54 = vmax.f32 %v809_v50, 0.0  ;;  %v1754_v55 = vadd.f32 %v1753_v53, %v1752_v51  ;;  %v1817_v56 = vpop.f32.mrb[5].mxu1  ;;  %v1755_v57 = vpop.f32.mrb[6].mxu0 }
 0x16d   : > { %v1818_v58 = vadd.f32 %v1817_v56, %v1816_v52  ;;  %v1819_v59 = vpop.f32.mrb[6].mxu1  ;;  %v1756_v60 = vpop.f32.mrb[7].mxu0 }
 0x16e   : > { %885 = vst [vmem:[%s2524_s17 + $0x8] sm:$0xff] %v869_v54  ;;  %v900_v61 = vpack.c.bf16 %v869_v54, %v868_v49  ;;  %v717_v62 = vadd.f32 %v1754_v55, %v2519_v35  ;;  %v1757_v63 = vadd.f32 %v1756_v60, %v1755_v57  ;;  %v1820_v0 = vpop.f32.mrb[7].mxu1 }
 0x16f   : > { %v1821_v1 = vadd.f32 %v1820_v0, %v1819_v59 }
 0x170   : > { %v814_v2 = vadd.f32 %v1818_v58, %v717_v62  ;;  %v720_v3 = vadd.f32 %v1757_v63, %v2519_v35  ;;  %1155 = vmatmul.mubr.bf16.vlgmr.msra.gmra.mrb[32].mxu0 %v900_v61  ;;  %1268 = vmatmul.mubr.bf16.vlgmr.msra.gmra.mrb[32].mxu1 %v900_v61 }
 0x171   : > { %1164 = vmatprep.mubr.bf16.mxu0 %v2220_v32  ;;  %1277 = vmatprep.mubr.bf16.mxu1 %v2220_v32 }
 0x172   : > { %v870_v4 = vmax.f32 %v814_v2, 0.0  ;;  %v817_v5 = vadd.f32 %v1821_v1, %v720_v3  ;;  %v1758_v6 = vpop.f32.mrb[8].mxu0 }
 0x173   : > { %v1822_v7 = vpop.f32.mrb[8].mxu1  ;;  %v1759_v8 = vpop.f32.mrb[9].mxu0 }
 0x174   : > { %886 = vst [vmem:[%s2524_s17 + $0x10] sm:$0xff] %v870_v4  ;;  %v871_v9 = vmax.f32 %v817_v5, 0.0  ;;  %v1760_v10 = vadd.f32 %v1759_v8, %v1758_v6  ;;  %v1823_v11 = vpop.f32.mrb[9].mxu1  ;;  %v1761_v12 = vpop.f32.mrb[10].mxu0 }
 0x175   : > { %v1824_v13 = vadd.f32 %v1823_v11, %v1822_v7  ;;  %v1825_v14 = vpop.f32.mrb[10].mxu1  ;;  %v1762_v15 = vpop.f32.mrb[11].mxu0 }
 0x176   : > { %887 = vst [vmem:[%s2524_s17 + $0x18] sm:$0xff] %v871_v9  ;;  %v725_v16 = vadd.f32 %v1760_v10, %v2519_v35  ;;  %v1763_v17 = vadd.f32 %v1762_v15, %v1761_v12  ;;  %v1826_v18 = vpop.f32.mrb[11].mxu1  ;;  %v901_v19 = vpack.c.bf16 %v871_v9, %v870_v4 }
 0x177   : > { %v1827_v20 = vadd.f32 %v1826_v18, %v1825_v14 }
 0x178   : > { %v822_v21 = vadd.f32 %v1824_v13, %v725_v16  ;;  %v728_v22 = vadd.f32 %v1763_v17, %v2519_v35  ;;  %1165 = vmatmul.mubr.bf16.gmra.mrb[36].mxu0 %v901_v19  ;;  %1278 = vmatmul.mubr.bf16.gmra.mrb[36].mxu1 %v901_v19 }
 0x179   : > { %1174 = vmatprep.mubr.bf16.mxu0 %v2220_v32  ;;  %1287 = vmatprep.mubr.bf16.mxu1 %v2220_v32 }
 0x17a   : > { %v872_v23 = vmax.f32 %v822_v21, 0.0  ;;  %v825_v24 = vadd.f32 %v1827_v20, %v728_v22  ;;  %v1764_v25 = vpop.f32.mrb[12].mxu0 }
 0x17b   : > { %v1828_v26 = vpop.f32.mrb[12].mxu1  ;;  %v1765_v27 = vpop.f32.mrb[13].mxu0 }
 0x17c   : > { %888 = vst [vmem:[%s2524_s17 + $0x20] sm:$0xff] %v872_v23  ;;  %v873_v28 = vmax.f32 %v825_v24, 0.0  ;;  %v1766_v29 = vadd.f32 %v1765_v27, %v1764_v25  ;;  %v1829_v30 = vpop.f32.mrb[13].mxu1  ;;  %v1767_v31 = vpop.f32.mrb[14].mxu0 }
 0x17d   : > { %v1830_v33 = vadd.f32 %v1829_v30, %v1828_v26  ;;  %v1831_v34 = vpop.f32.mrb[14].mxu1  ;;  %v1768_v36 = vpop.f32.mrb[15].mxu0 }
 0x17e   : > { %889 = vst [vmem:[%s2524_s17 + $0x28] sm:$0xff] %v873_v28  ;;  %v733_v37 = vadd.f32 %v1766_v29, %v2519_v35  ;;  %v1769_v38 = vadd.f32 %v1768_v36, %v1767_v31  ;;  %v1832_v39 = vpop.f32.mrb[15].mxu1  ;;  %v902_v40 = vpack.c.bf16 %v873_v28, %v872_v23 }
 0x17f   : > { %v1833_v41 = vadd.f32 %v1832_v39, %v1831_v34 }
 0x180   : > { %v830_v42 = vadd.f32 %v1830_v33, %v733_v37  ;;  %v736_v43 = vadd.f32 %v1769_v38, %v2519_v35  ;;  %1175 = vmatmul.mubr.bf16.gmra.mrb[40].mxu0 %v902_v40  ;;  %1288 = vmatmul.mubr.bf16.gmra.mrb[40].mxu1 %v902_v40 }
 0x181   : > { %1184 = vmatprep.mubr.bf16.mxu0 %v2220_v32  ;;  %1297 = vmatprep.mubr.bf16.mxu1 %v2220_v32 }
 0x182   : > { %v874_v44 = vmax.f32 %v830_v42, 0.0  ;;  %v833_v45 = vadd.f32 %v1833_v41, %v736_v43  ;;  %v1770_v46 = vpop.f32.mrb[16].mxu0 }
 0x183   : > { %v1834_v47 = vpop.f32.mrb[16].mxu1  ;;  %v1771_v48 = vpop.f32.mrb[17].mxu0 }
 0x184   : > { %890 = vst [vmem:[%s2524_s17 + $0x30] sm:$0xff] %v874_v44  ;;  %v875_v49 = vmax.f32 %v833_v45, 0.0  ;;  %v1772_v50 = vadd.f32 %v1771_v48, %v1770_v46  ;;  %v1835_v51 = vpop.f32.mrb[17].mxu1  ;;  %v1773_v52 = vpop.f32.mrb[18].mxu0 }
 0x185   : > { %v1836_v53 = vadd.f32 %v1835_v51, %v1834_v47  ;;  %v1837_v54 = vpop.f32.mrb[18].mxu1  ;;  %v1774_v55 = vpop.f32.mrb[19].mxu0 }
 0x186   : > { %891 = vst [vmem:[%s2524_s17 + $0x38] sm:$0xff] %v875_v49  ;;  %v741_v56 = vadd.f32 %v1772_v50, %v2519_v35  ;;  %v1775_v57 = vadd.f32 %v1774_v55, %v1773_v52  ;;  %v1838_v58 = vpop.f32.mrb[19].mxu1  ;;  %v903_v59 = vpack.c.bf16 %v875_v49, %v874_v44 }
 0x187   : > { %v1839_v60 = vadd.f32 %v1838_v58, %v1837_v54 }
 0x188   : > { %v838_v61 = vadd.f32 %v1836_v53, %v741_v56  ;;  %v744_v62 = vadd.f32 %v1775_v57, %v2519_v35  ;;  %1185 = vmatmul.mubr.bf16.gmra.mrb[44].mxu0 %v903_v59  ;;  %1298 = vmatmul.mubr.bf16.gmra.mrb[44].mxu1 %v903_v59 }
 0x189   : > { %1194 = vmatprep.mubr.bf16.mxu0 %v2220_v32  ;;  %1307 = vmatprep.mubr.bf16.mxu1 %v2220_v32 }
 0x18a   : > { %v876_v63 = vmax.f32 %v838_v61, 0.0  ;;  %v841_v0 = vadd.f32 %v1839_v60, %v744_v62  ;;  %v1776_v1 = vpop.f32.mrb[20].mxu0 }
 0x18b   : > { %v1840_v2 = vpop.f32.mrb[20].mxu1  ;;  %v1777_v3 = vpop.f32.mrb[21].mxu0 }
 0x18c   : > { %892 = vst [vmem:[%s2524_s17 + $0x40] sm:$0xff] %v876_v63  ;;  %v877_v4 = vmax.f32 %v841_v0, 0.0  ;;  %v1778_v5 = vadd.f32 %v1777_v3, %v1776_v1  ;;  %v1841_v6 = vpop.f32.mrb[21].mxu1  ;;  %v1779_v7 = vpop.f32.mrb[22].mxu0 }
 0x18d   : > { %v1842_v8 = vadd.f32 %v1841_v6, %v1840_v2  ;;  %v1843_v9 = vpop.f32.mrb[22].mxu1  ;;  %v1780_v10 = vpop.f32.mrb[23].mxu0 }
 0x18e   : > { %893 = vst [vmem:[%s2524_s17 + $0x48] sm:$0xff] %v877_v4  ;;  %v749_v11 = vadd.f32 %v1778_v5, %v2519_v35  ;;  %v1781_v12 = vadd.f32 %v1780_v10, %v1779_v7  ;;  %v1844_v13 = vpop.f32.mrb[23].mxu1  ;;  %v904_v14 = vpack.c.bf16 %v877_v4, %v876_v63 }
 0x18f   : > { %v1845_v15 = vadd.f32 %v1844_v13, %v1843_v9 }
 0x190   : > { %v846_v16 = vadd.f32 %v1842_v8, %v749_v11  ;;  %v752_v17 = vadd.f32 %v1781_v12, %v2519_v35  ;;  %1195 = vmatmul.mubr.bf16.gmra.mrb[48].mxu0 %v904_v14  ;;  %1308 = vmatmul.mubr.bf16.gmra.mrb[48].mxu1 %v904_v14 }
 0x191   : > { %1204 = vmatprep.mubr.bf16.mxu0 %v2220_v32  ;;  %1317 = vmatprep.mubr.bf16.mxu1 %v2220_v32 }
 0x192   : > { %v878_v18 = vmax.f32 %v846_v16, 0.0  ;;  %v849_v19 = vadd.f32 %v1845_v15, %v752_v17  ;;  %v1782_v20 = vpop.f32.mrb[24].mxu0 }
 0x193   : > { %v1846_v21 = vpop.f32.mrb[24].mxu1  ;;  %v1783_v22 = vpop.f32.mrb[25].mxu0 }
 0x194   : > { %894 = vst [vmem:[%s2524_s17 + $0x50] sm:$0xff] %v878_v18  ;;  %v879_v23 = vmax.f32 %v849_v19, 0.0  ;;  %v1784_v24 = vadd.f32 %v1783_v22, %v1782_v20  ;;  %v1847_v25 = vpop.f32.mrb[25].mxu1  ;;  %v1785_v26 = vpop.f32.mrb[26].mxu0 }
 0x195   : > { %v1848_v27 = vadd.f32 %v1847_v25, %v1846_v21  ;;  %v1849_v28 = vpop.f32.mrb[26].mxu1  ;;  %v1786_v29 = vpop.f32.mrb[27].mxu0 }
 0x196   : > { %895 = vst [vmem:[%s2524_s17 + $0x58] sm:$0xff] %v879_v23  ;;  %v757_v30 = vadd.f32 %v1784_v24, %v2519_v35  ;;  %v1787_v31 = vadd.f32 %v1786_v29, %v1785_v26  ;;  %v1850_v33 = vpop.f32.mrb[27].mxu1  ;;  %v905_v34 = vpack.c.bf16 %v879_v23, %v878_v18 }
 0x197   : > { %v1851_v36 = vadd.f32 %v1850_v33, %v1849_v28 }
 0x198   : > { %v854_v37 = vadd.f32 %v1848_v27, %v757_v30  ;;  %v760_v38 = vadd.f32 %v1787_v31, %v2519_v35  ;;  %1205 = vmatmul.mubr.bf16.gmra.mrb[52].mxu0 %v905_v34  ;;  %1318 = vmatmul.mubr.bf16.gmra.mrb[52].mxu1 %v905_v34 }
 0x199   : > { %1214 = vmatprep.mubr.bf16.mxu0 %v2220_v32  ;;  %1327 = vmatprep.mubr.bf16.mxu1 %v2220_v32 }
 0x19a   : > { %v880_v39 = vmax.f32 %v854_v37, 0.0  ;;  %v857_v40 = vadd.f32 %v1851_v36, %v760_v38  ;;  %v1788_v41 = vpop.f32.mrb[28].mxu0 }
 0x19b   : > { %v1852_v42 = vpop.f32.mrb[28].mxu1  ;;  %v1789_v43 = vpop.f32.mrb[29].mxu0 }
 0x19c   : > { %896 = vst [vmem:[%s2524_s17 + $0x60] sm:$0xff] %v880_v39  ;;  %v881_v44 = vmax.f32 %v857_v40, 0.0  ;;  %v1790_v45 = vadd.f32 %v1789_v43, %v1788_v41  ;;  %v1853_v46 = vpop.f32.mrb[29].mxu1  ;;  %v1791_v47 = vpop.f32.mrb[30].mxu0 }
 0x19d   : > { %v1854_v48 = vadd.f32 %v1853_v46, %v1852_v42  ;;  %v1855_v49 = vpop.f32.mrb[30].mxu1  ;;  %v1792_v50 = vpop.f32.mrb[31].mxu0 }
 0x19e   : > { %897 = vst [vmem:[%s2524_s17 + $0x68] sm:$0xff] %v881_v44  ;;  %v765_v51 = vadd.f32 %v1790_v45, %v2519_v35  ;;  %v1793_v52 = vadd.f32 %v1792_v50, %v1791_v47  ;;  %v1856_v53 = vpop.f32.mrb[31].mxu1  ;;  %v906_v54 = vpack.c.bf16 %v881_v44, %v880_v39 }
 0x19f   : > { %v1857_v55 = vadd.f32 %v1856_v53, %v1855_v49 }
 0x1a0   : > { %v862_v56 = vadd.f32 %v1854_v48, %v765_v51  ;;  %v768_v57 = vadd.f32 %v1793_v52, %v2519_v35  ;;  %1215 = vmatmul.mubr.bf16.gmra.mrb[56].mxu0 %v906_v54  ;;  %1328 = vmatmul.mubr.bf16.gmra.mrb[56].mxu1 %v906_v54 }
 0x1a1   : > { %1224 = vmatprep.mubr.bf16.mxu0 %v2220_v32  ;;  %1337 = vmatprep.mubr.bf16.mxu1 %v2220_v32 }
 0x1a2   : > { %v882_v58 = vmax.f32 %v862_v56, 0.0  ;;  %v865_v59 = vadd.f32 %v1857_v55, %v768_v57 }
 0x1a4   : > { %898 = vst [vmem:[%s2524_s17 + $0x70] sm:$0xff] %v882_v58  ;;  %v883_v60 = vmax.f32 %v865_v59, 0.0 }
 0x1a6   : > { %899 = vst [vmem:[%s2524_s17 + $0x78] sm:$0xff] %v883_v60  ;;  %v907_v61 = vpack.c.bf16 %v883_v60, %v882_v58 }
 0x1a8   : > { %1225 = vmatmul.mubr.bf16.gmra.mrb[60].mxu0 %v907_v61  ;;  %1338 = vmatmul.mubr.bf16.gmra.mrb[60].mxu1 %v907_v61 }
 0x1a9   : > { %2120 = shalt.err (!%p2117_p2)
}
 0x1aa   : > { %s2121_s29 = scalar_lea.hbm %s2574_s7, 2048  ;;  %s2125_s18 = scalar_lea.hbm %s2802_s5, 4096 }
 0x1ab   : > { %p2122_p13 = scmp.ne.s32.totalorder %s2574_s7, %s2121_s29  ;;  %p2126_p4 = scmp.lt.u32.totalorder %s2574_s7, %s2802_s5 }
 0x1ac   : > { %p2127_p7 = scmp.lt.u32.totalorder %s2125_s18, %s2121_s29  ;;  %p2129_p11 = scmp.lt.u32.totalorder %s2121_s29, %s2574_s7 }
 0x1ad   : > { %p2123_p6 = pnand %p2122_p13, %p2817_p0 }
 0x1ae   : > { %p2128_p8 = por %p2127_p7, %p2126_p4 }
 0x1af   : > { %p2124_p10 = pneg %p2123_p6 }
 0x1b0   : > { %p2130_p1 = por %p2129_p11, %p2128_p8 }
 0x1b2   : > { %p2131_p3 = pnand %p2130_p1, %p2124_p10 }
 0x1b4   : > { %2134 = shalt.err (!%p2131_p3)
}
 0x1b5   : > { %s2222_s9 = smov 128   ;;  %s2223_s14 = smov 8   ;;  %v942_v32 = vlaneseq  ;;  %v940_v0 = vld [vmem:[%s2801_s4] sm:$0xf] }
 0x1b6   : > { %1868 = dma.vmem_to_hbm [thread:$0]  (%p2817_p0), %s2577_s30, 2048, %s2574_s7, %s1477_s20, %s2222_s9, %s2222_s9, %s2223_s14  }
 0x1b7   : > { %v943_v35 = vshrl.u32 %v942_v32, 7  ;;  %s2624_s7 = scalar_lea.vmem [#allocation9], %s1646_s10  ;;  %s1729_s10 = sshll.u32 %s2283_s25, 13 }
 0x1b8   : > { %s1512_s30 = sshll.u32 %s2624_s7, 4  ;;  %s2745_s29 = scalar_lea.hbm %s2803_s6, %s1729_s10  ;;  %s2747_s30 = int_to_ptr.vmem [resolvable:$true] %s1512_s30 }
 0x1b9   : > { %v944_v62 = vsub.s32 0, %v943_v35  ;;  %v952_v63 = vsub.s32 2, %v943_v35  ;;  %v948_v1 = vsub.s32 1, %v943_v35  ;;  %v956_v2 = vsub.s32 3, %v943_v35  ;;  %s1482_s16 = scalar_lea.sflag [#allocation10], %s2434_s13  ;;  %s2135_s17 = scalar_lea.vmem %s2747_s30, 8192 }
 0x1ba   : > { %p2136_p5 = scmp.ne.s32.totalorder %s2747_s30, %s2135_s17  ;;  %s2224_s18 = smov [#allocation9]  }
 0x1bb   : > { %v2606_v3 = vrot.slane %v940_v0, %v944_v62  ;;  %v2608_v4 = vrot.slane %v940_v0, %v952_v63  ;;  %v2610_v5 = vrot.slane %v940_v0, %v948_v1  ;;  %v2612_v6 = vrot.slane %v940_v0, %v956_v2  ;;  %s2139_s19 = sshll.u32 %s2224_s18, 4  ;;  %s2140_s19 = int_to_ptr.vmem [resolvable:$false] %s2139_s19 }
 0x1bc   : > { %p2137_p9 = pnand %p2136_p5, %p2817_p0  ;;  %s2141_s15 = scalar_lea.vmem %s2140_s19, 16384 }
 0x1bd   : > { %p2142_p2 = scmp.lt.s32.totalorder %s2747_s30, %s2140_s19  ;;  %p2143_p13 = scmp.lt.s32.totalorder %s2141_s15, %s2135_s17 }
 0x1be   : > { %p2138_p12 = pneg %p2137_p9 }
 0x1bf   : > { %p2144_p6 = por %p2143_p13, %p2142_p2 }
 0x1c1   : > { %p2145_p10 = pnand %p2144_p6, %p2138_p12 }
 0x243   : > { %v1156_v7 = vpop.f32.mrb[32].mxu0  ;;  %v1269_v8 = vpop.f32.mrb[32].mxu1 }
 0x244   : > { %v1157_v9 = vadd.f32 %v1156_v7, %v2606_v3  ;;  %v1270_v10 = vadd.f32 %v1269_v8, %v2608_v4  ;;  %v1158_v11 = vpop.f32.mrb[33].mxu0  ;;  %v1271_v12 = vpop.f32.mrb[33].mxu1 }
 0x245   : > { %v1159_v13 = vadd.f32 %v1158_v11, %v2610_v5  ;;  %v1272_v14 = vadd.f32 %v1271_v12, %v2612_v6  ;;  %v1160_v15 = vpop.f32.mrb[34].mxu0  ;;  %v1273_v16 = vpop.f32.mrb[34].mxu1 }
 0x246   : > { %v1348_v17 = vmax.f32 %v1157_v9, 0.0  ;;  %v1350_v18 = vmax.f32 %v1270_v10, 0.0  ;;  %v1161_v19 = vadd.f32 %v1160_v15, %v2606_v3  ;;  %v1274_v20 = vadd.f32 %v1273_v16, %v2608_v4  ;;  %v1162_v21 = vpop.f32.mrb[35].mxu0  ;;  %v1275_v22 = vpop.f32.mrb[35].mxu1 }
 0x247   : > { %v1349_v23 = vmax.f32 %v1159_v13, 0.0  ;;  %v1351_v24 = vmax.f32 %v1272_v14, 0.0  ;;  %v1163_v25 = vadd.f32 %v1162_v21, %v2610_v5  ;;  %v1276_v26 = vadd.f32 %v1275_v22, %v2612_v6 }
 0x248   : > { %1412 = vst [vmem:[%s2624_s7] sm:$0xff] %v1348_v17  ;;  %1414 = vst [vmem:[%s2624_s7 + $0x10] sm:$0xff] %v1350_v18  ;;  %v1352_v27 = vmax.f32 %v1161_v19, 0.0  ;;  %v1354_v28 = vmax.f32 %v1274_v20, 0.0 }
 0x249   : > { %1413 = vst [vmem:[%s2624_s7 + $0x8] sm:$0xff] %v1349_v23  ;;  %1415 = vst [vmem:[%s2624_s7 + $0x18] sm:$0xff] %v1351_v24  ;;  %v1353_v29 = vmax.f32 %v1163_v25, 0.0  ;;  %v1355_v30 = vmax.f32 %v1276_v26, 0.0 }
 0x24a   : > { %1416 = vst [vmem:[%s2624_s7 + $0x20] sm:$0xff] %v1352_v27  ;;  %1418 = vst [vmem:[%s2624_s7 + $0x30] sm:$0xff] %v1354_v28 }
 0x24b   : > { %1417 = vst [vmem:[%s2624_s7 + $0x28] sm:$0xff] %v1353_v29  ;;  %1419 = vst [vmem:[%s2624_s7 + $0x38] sm:$0xff] %v1355_v30  ;;  %v1166_v31 = vpop.f32.mrb[36].mxu0  ;;  %v1279_v33 = vpop.f32.mrb[36].mxu1 }
 0x24c   : > { %v1167_v34 = vadd.f32 %v1166_v31, %v2606_v3  ;;  %v1280_v36 = vadd.f32 %v1279_v33, %v2608_v4  ;;  %v1168_v37 = vpop.f32.mrb[37].mxu0  ;;  %v1281_v38 = vpop.f32.mrb[37].mxu1 }
 0x24d   : > { %v1169_v39 = vadd.f32 %v1168_v37, %v2610_v5  ;;  %v1282_v40 = vadd.f32 %v1281_v38, %v2612_v6  ;;  %v1170_v41 = vpop.f32.mrb[38].mxu0  ;;  %v1283_v42 = vpop.f32.mrb[38].mxu1 }
 0x24e   : > { %v1356_v43 = vmax.f32 %v1167_v34, 0.0  ;;  %v1358_v44 = vmax.f32 %v1280_v36, 0.0  ;;  %v1171_v45 = vadd.f32 %v1170_v41, %v2606_v3  ;;  %v1284_v46 = vadd.f32 %v1283_v42, %v2608_v4  ;;  %v1172_v47 = vpop.f32.mrb[39].mxu0  ;;  %v1285_v48 = vpop.f32.mrb[39].mxu1 }
 0x24f   : > { %v1357_v49 = vmax.f32 %v1169_v39, 0.0  ;;  %v1359_v50 = vmax.f32 %v1282_v40, 0.0  ;;  %v1173_v51 = vadd.f32 %v1172_v47, %v2610_v5  ;;  %v1286_v52 = vadd.f32 %v1285_v48, %v2612_v6 }
 0x250   : > { %1420 = vst [vmem:[%s2624_s7 + $0x40] sm:$0xff] %v1356_v43  ;;  %1422 = vst [vmem:[%s2624_s7 + $0x50] sm:$0xff] %v1358_v44  ;;  %v1360_v53 = vmax.f32 %v1171_v45, 0.0  ;;  %v1362_v54 = vmax.f32 %v1284_v46, 0.0 }
 0x251   : > { %1421 = vst [vmem:[%s2624_s7 + $0x48] sm:$0xff] %v1357_v49  ;;  %1423 = vst [vmem:[%s2624_s7 + $0x58] sm:$0xff] %v1359_v50  ;;  %v1361_v55 = vmax.f32 %v1173_v51, 0.0  ;;  %v1363_v56 = vmax.f32 %v1286_v52, 0.0 }
 0x252   : > { %1424 = vst [vmem:[%s2624_s7 + $0x60] sm:$0xff] %v1360_v53  ;;  %1426 = vst [vmem:[%s2624_s7 + $0x70] sm:$0xff] %v1362_v54 }
 0x253   : > { %1425 = vst [vmem:[%s2624_s7 + $0x68] sm:$0xff] %v1361_v55  ;;  %1427 = vst [vmem:[%s2624_s7 + $0x78] sm:$0xff] %v1363_v56  ;;  %v1176_v57 = vpop.f32.mrb[40].mxu0  ;;  %v1289_v58 = vpop.f32.mrb[40].mxu1 }
 0x254   : > { %v1177_v59 = vadd.f32 %v1176_v57, %v2606_v3  ;;  %v1290_v60 = vadd.f32 %v1289_v58, %v2608_v4  ;;  %v1178_v61 = vpop.f32.mrb[41].mxu0  ;;  %v1291_v32 = vpop.f32.mrb[41].mxu1 }
 0x255   : > { %v1179_v35 = vadd.f32 %v1178_v61, %v2610_v5  ;;  %v1292_v62 = vadd.f32 %v1291_v32, %v2612_v6  ;;  %v1180_v63 = vpop.f32.mrb[42].mxu0  ;;  %v1293_v0 = vpop.f32.mrb[42].mxu1 }
 0x256   : > { %v1364_v1 = vmax.f32 %v1177_v59, 0.0  ;;  %v1366_v2 = vmax.f32 %v1290_v60, 0.0  ;;  %v1181_v7 = vadd.f32 %v1180_v63, %v2606_v3  ;;  %v1294_v8 = vadd.f32 %v1293_v0, %v2608_v4  ;;  %v1182_v9 = vpop.f32.mrb[43].mxu0  ;;  %v1295_v10 = vpop.f32.mrb[43].mxu1 }
 0x257   : > { %v1365_v11 = vmax.f32 %v1179_v35, 0.0  ;;  %v1367_v12 = vmax.f32 %v1292_v62, 0.0  ;;  %v1183_v13 = vadd.f32 %v1182_v9, %v2610_v5  ;;  %v1296_v14 = vadd.f32 %v1295_v10, %v2612_v6 }
 0x258   : > { %1428 = vst [vmem:[%s2624_s7 + $0x80] sm:$0xff] %v1364_v1  ;;  %1430 = vst [vmem:[%s2624_s7 + $0x90] sm:$0xff] %v1366_v2  ;;  %v1368_v15 = vmax.f32 %v1181_v7, 0.0  ;;  %v1370_v16 = vmax.f32 %v1294_v8, 0.0 }
 0x259   : > { %1429 = vst [vmem:[%s2624_s7 + $0x88] sm:$0xff] %v1365_v11  ;;  %1431 = vst [vmem:[%s2624_s7 + $0x98] sm:$0xff] %v1367_v12  ;;  %v1369_v17 = vmax.f32 %v1183_v13, 0.0  ;;  %v1371_v18 = vmax.f32 %v1296_v14, 0.0 }
 0x25a   : > { %1432 = vst [vmem:[%s2624_s7 + $0xa0] sm:$0xff] %v1368_v15  ;;  %1434 = vst [vmem:[%s2624_s7 + $0xb0] sm:$0xff] %v1370_v16 }
 0x25b   : > { %1433 = vst [vmem:[%s2624_s7 + $0xa8] sm:$0xff] %v1369_v17  ;;  %1435 = vst [vmem:[%s2624_s7 + $0xb8] sm:$0xff] %v1371_v18  ;;  %v1186_v19 = vpop.f32.mrb[44].mxu0  ;;  %v1299_v20 = vpop.f32.mrb[44].mxu1 }
 0x25c   : > { %v1187_v21 = vadd.f32 %v1186_v19, %v2606_v3  ;;  %v1300_v22 = vadd.f32 %v1299_v20, %v2608_v4  ;;  %v1188_v23 = vpop.f32.mrb[45].mxu0  ;;  %v1301_v24 = vpop.f32.mrb[45].mxu1 }
 0x25d   : > { %v1189_v25 = vadd.f32 %v1188_v23, %v2610_v5  ;;  %v1302_v26 = vadd.f32 %v1301_v24, %v2612_v6  ;;  %v1190_v27 = vpop.f32.mrb[46].mxu0  ;;  %v1303_v28 = vpop.f32.mrb[46].mxu1 }
 0x25e   : > { %v1372_v29 = vmax.f32 %v1187_v21, 0.0  ;;  %v1374_v30 = vmax.f32 %v1300_v22, 0.0  ;;  %v1191_v31 = vadd.f32 %v1190_v27, %v2606_v3  ;;  %v1304_v33 = vadd.f32 %v1303_v28, %v2608_v4  ;;  %v1192_v34 = vpop.f32.mrb[47].mxu0  ;;  %v1305_v36 = vpop.f32.mrb[47].mxu1 }
 0x25f   : > { %v1373_v37 = vmax.f32 %v1189_v25, 0.0  ;;  %v1375_v38 = vmax.f32 %v1302_v26, 0.0  ;;  %v1193_v39 = vadd.f32 %v1192_v34, %v2610_v5  ;;  %v1306_v40 = vadd.f32 %v1305_v36, %v2612_v6 }
 0x260   : > { %1436 = vst [vmem:[%s2624_s7 + $0xc0] sm:$0xff] %v1372_v29  ;;  %1438 = vst [vmem:[%s2624_s7 + $0xd0] sm:$0xff] %v1374_v30  ;;  %v1376_v41 = vmax.f32 %v1191_v31, 0.0  ;;  %v1378_v42 = vmax.f32 %v1304_v33, 0.0 }
 0x261   : > { %1437 = vst [vmem:[%s2624_s7 + $0xc8] sm:$0xff] %v1373_v37  ;;  %1439 = vst [vmem:[%s2624_s7 + $0xd8] sm:$0xff] %v1375_v38  ;;  %v1377_v43 = vmax.f32 %v1193_v39, 0.0  ;;  %v1379_v44 = vmax.f32 %v1306_v40, 0.0 }
 0x262   : > { %1440 = vst [vmem:[%s2624_s7 + $0xe0] sm:$0xff] %v1376_v41  ;;  %1442 = vst [vmem:[%s2624_s7 + $0xf0] sm:$0xff] %v1378_v42 }
 0x263   : > { %1441 = vst [vmem:[%s2624_s7 + $0xe8] sm:$0xff] %v1377_v43  ;;  %1443 = vst [vmem:[%s2624_s7 + $0xf8] sm:$0xff] %v1379_v44  ;;  %v1196_v45 = vpop.f32.mrb[48].mxu0  ;;  %v1309_v46 = vpop.f32.mrb[48].mxu1 }
 0x264   : > { %v1197_v47 = vadd.f32 %v1196_v45, %v2606_v3  ;;  %v1310_v48 = vadd.f32 %v1309_v46, %v2608_v4  ;;  %v1198_v49 = vpop.f32.mrb[49].mxu0  ;;  %v1311_v50 = vpop.f32.mrb[49].mxu1 }
 0x265   : > { %v1199_v51 = vadd.f32 %v1198_v49, %v2610_v5  ;;  %v1312_v52 = vadd.f32 %v1311_v50, %v2612_v6  ;;  %v1200_v53 = vpop.f32.mrb[50].mxu0  ;;  %v1313_v54 = vpop.f32.mrb[50].mxu1 }
 0x266   : > { %v1380_v55 = vmax.f32 %v1197_v47, 0.0  ;;  %v1382_v56 = vmax.f32 %v1310_v48, 0.0  ;;  %v1201_v57 = vadd.f32 %v1200_v53, %v2606_v3  ;;  %v1314_v58 = vadd.f32 %v1313_v54, %v2608_v4  ;;  %v1202_v59 = vpop.f32.mrb[51].mxu0  ;;  %v1315_v60 = vpop.f32.mrb[51].mxu1 }
 0x267   : > { %v1381_v61 = vmax.f32 %v1199_v51, 0.0  ;;  %v1383_v32 = vmax.f32 %v1312_v52, 0.0  ;;  %v1203_v35 = vadd.f32 %v1202_v59, %v2610_v5  ;;  %v1316_v62 = vadd.f32 %v1315_v60, %v2612_v6 }
 0x268   : > { %1444 = vst [vmem:[%s2624_s7 + $0x100] sm:$0xff] %v1380_v55  ;;  %1446 = vst [vmem:[%s2624_s7 + $0x110] sm:$0xff] %v1382_v56  ;;  %v1384_v63 = vmax.f32 %v1201_v57, 0.0  ;;  %v1386_v0 = vmax.f32 %v1314_v58, 0.0 }
 0x269   : > { %1445 = vst [vmem:[%s2624_s7 + $0x108] sm:$0xff] %v1381_v61  ;;  %1447 = vst [vmem:[%s2624_s7 + $0x118] sm:$0xff] %v1383_v32  ;;  %v1385_v1 = vmax.f32 %v1203_v35, 0.0  ;;  %v1387_v2 = vmax.f32 %v1316_v62, 0.0 }
 0x26a   : > { %1448 = vst [vmem:[%s2624_s7 + $0x120] sm:$0xff] %v1384_v63  ;;  %1450 = vst [vmem:[%s2624_s7 + $0x130] sm:$0xff] %v1386_v0 }
 0x26b   : > { %1449 = vst [vmem:[%s2624_s7 + $0x128] sm:$0xff] %v1385_v1  ;;  %1451 = vst [vmem:[%s2624_s7 + $0x138] sm:$0xff] %v1387_v2  ;;  %v1206_v7 = vpop.f32.mrb[52].mxu0  ;;  %v1319_v8 = vpop.f32.mrb[52].mxu1 }
 0x26c   : > { %v1207_v9 = vadd.f32 %v1206_v7, %v2606_v3  ;;  %v1320_v10 = vadd.f32 %v1319_v8, %v2608_v4  ;;  %v1208_v11 = vpop.f32.mrb[53].mxu0  ;;  %v1321_v12 = vpop.f32.mrb[53].mxu1 }
 0x26d   : > { %v1209_v13 = vadd.f32 %v1208_v11, %v2610_v5  ;;  %v1322_v14 = vadd.f32 %v1321_v12, %v2612_v6  ;;  %v1210_v15 = vpop.f32.mrb[54].mxu0  ;;  %v1323_v16 = vpop.f32.mrb[54].mxu1 }
 0x26e   : > { %v1388_v17 = vmax.f32 %v1207_v9, 0.0  ;;  %v1390_v18 = vmax.f32 %v1320_v10, 0.0  ;;  %v1211_v19 = vadd.f32 %v1210_v15, %v2606_v3  ;;  %v1324_v20 = vadd.f32 %v1323_v16, %v2608_v4  ;;  %v1212_v21 = vpop.f32.mrb[55].mxu0  ;;  %v1325_v22 = vpop.f32.mrb[55].mxu1 }
 0x26f   : > { %v1389_v23 = vmax.f32 %v1209_v13, 0.0  ;;  %v1391_v24 = vmax.f32 %v1322_v14, 0.0  ;;  %v1213_v25 = vadd.f32 %v1212_v21, %v2610_v5  ;;  %v1326_v26 = vadd.f32 %v1325_v22, %v2612_v6 }
 0x270   : > { %1452 = vst [vmem:[%s2624_s7 + $0x140] sm:$0xff] %v1388_v17  ;;  %1454 = vst [vmem:[%s2624_s7 + $0x150] sm:$0xff] %v1390_v18  ;;  %v1392_v27 = vmax.f32 %v1211_v19, 0.0  ;;  %v1394_v28 = vmax.f32 %v1324_v20, 0.0 }
 0x271   : > { %1453 = vst [vmem:[%s2624_s7 + $0x148] sm:$0xff] %v1389_v23  ;;  %1455 = vst [vmem:[%s2624_s7 + $0x158] sm:$0xff] %v1391_v24  ;;  %v1393_v29 = vmax.f32 %v1213_v25, 0.0  ;;  %v1395_v30 = vmax.f32 %v1326_v26, 0.0 }
 0x272   : > { %1456 = vst [vmem:[%s2624_s7 + $0x160] sm:$0xff] %v1392_v27  ;;  %1458 = vst [vmem:[%s2624_s7 + $0x170] sm:$0xff] %v1394_v28 }
 0x273   : > { %1457 = vst [vmem:[%s2624_s7 + $0x168] sm:$0xff] %v1393_v29  ;;  %1459 = vst [vmem:[%s2624_s7 + $0x178] sm:$0xff] %v1395_v30  ;;  %v1216_v31 = vpop.f32.mrb[56].mxu0  ;;  %v1329_v33 = vpop.f32.mrb[56].mxu1 }
 0x274   : > { %v1217_v34 = vadd.f32 %v1216_v31, %v2606_v3  ;;  %v1330_v36 = vadd.f32 %v1329_v33, %v2608_v4  ;;  %v1218_v37 = vpop.f32.mrb[57].mxu0  ;;  %v1331_v38 = vpop.f32.mrb[57].mxu1 }
 0x275   : > { %v1219_v39 = vadd.f32 %v1218_v37, %v2610_v5  ;;  %v1332_v40 = vadd.f32 %v1331_v38, %v2612_v6  ;;  %v1220_v41 = vpop.f32.mrb[58].mxu0  ;;  %v1333_v42 = vpop.f32.mrb[58].mxu1 }
 0x276   : > { %v1396_v43 = vmax.f32 %v1217_v34, 0.0  ;;  %v1398_v44 = vmax.f32 %v1330_v36, 0.0  ;;  %v1221_v45 = vadd.f32 %v1220_v41, %v2606_v3  ;;  %v1334_v46 = vadd.f32 %v1333_v42, %v2608_v4  ;;  %v1222_v47 = vpop.f32.mrb[59].mxu0  ;;  %v1335_v48 = vpop.f32.mrb[59].mxu1 }
 0x277   : > { %v1397_v49 = vmax.f32 %v1219_v39, 0.0  ;;  %v1399_v50 = vmax.f32 %v1332_v40, 0.0  ;;  %v1223_v51 = vadd.f32 %v1222_v47, %v2610_v5  ;;  %v1336_v52 = vadd.f32 %v1335_v48, %v2612_v6 }
 0x278   : > { %1460 = vst [vmem:[%s2624_s7 + $0x180] sm:$0xff] %v1396_v43  ;;  %1462 = vst [vmem:[%s2624_s7 + $0x190] sm:$0xff] %v1398_v44  ;;  %v1400_v53 = vmax.f32 %v1221_v45, 0.0  ;;  %v1402_v54 = vmax.f32 %v1334_v46, 0.0 }
 0x279   : > { %1461 = vst [vmem:[%s2624_s7 + $0x188] sm:$0xff] %v1397_v49  ;;  %1463 = vst [vmem:[%s2624_s7 + $0x198] sm:$0xff] %v1399_v50  ;;  %v1401_v55 = vmax.f32 %v1223_v51, 0.0  ;;  %v1403_v56 = vmax.f32 %v1336_v52, 0.0 }
 0x27a   : > { %1464 = vst [vmem:[%s2624_s7 + $0x1a0] sm:$0xff] %v1400_v53  ;;  %1466 = vst [vmem:[%s2624_s7 + $0x1b0] sm:$0xff] %v1402_v54 }
 0x27b   : > { %1465 = vst [vmem:[%s2624_s7 + $0x1a8] sm:$0xff] %v1401_v55  ;;  %1467 = vst [vmem:[%s2624_s7 + $0x1b8] sm:$0xff] %v1403_v56  ;;  %v1226_v57 = vpop.f32.mrb[60].mxu0  ;;  %v1339_v58 = vpop.f32.mrb[60].mxu1 }
 0x27c   : > { %v1227_v59 = vadd.f32 %v1226_v57, %v2606_v3  ;;  %v1340_v60 = vadd.f32 %v1339_v58, %v2608_v4  ;;  %v1228_v61 = vpop.f32.mrb[61].mxu0  ;;  %v1341_v32 = vpop.f32.mrb[61].mxu1 }
 0x27d   : > { %v1229_v35 = vadd.f32 %v1228_v61, %v2610_v5  ;;  %v1342_v62 = vadd.f32 %v1341_v32, %v2612_v6  ;;  %v1230_v63 = vpop.f32.mrb[62].mxu0  ;;  %v1343_v0 = vpop.f32.mrb[62].mxu1 }
 0x27e   : > { %v1404_v1 = vmax.f32 %v1227_v59, 0.0  ;;  %v1406_v2 = vmax.f32 %v1340_v60, 0.0  ;;  %v1231_v7 = vadd.f32 %v1230_v63, %v2606_v3  ;;  %v1344_v8 = vadd.f32 %v1343_v0, %v2608_v4  ;;  %v1232_v9 = vpop.f32.mrb[63].mxu0  ;;  %v1345_v10 = vpop.f32.mrb[63].mxu1 }
 0x27f   : > { %v1405_v11 = vmax.f32 %v1229_v35, 0.0  ;;  %v1407_v12 = vmax.f32 %v1342_v62, 0.0  ;;  %v1233_v13 = vadd.f32 %v1232_v9, %v2610_v5  ;;  %v1346_v14 = vadd.f32 %v1345_v10, %v2612_v6 }
 0x280   : > { %1468 = vst [vmem:[%s2624_s7 + $0x1c0] sm:$0xff] %v1404_v1  ;;  %1470 = vst [vmem:[%s2624_s7 + $0x1d0] sm:$0xff] %v1406_v2  ;;  %v1408_v15 = vmax.f32 %v1231_v7, 0.0  ;;  %v1410_v3 = vmax.f32 %v1344_v8, 0.0 }
 0x281   : > { %1469 = vst [vmem:[%s2624_s7 + $0x1c8] sm:$0xff] %v1405_v11  ;;  %1471 = vst [vmem:[%s2624_s7 + $0x1d8] sm:$0xff] %v1407_v12  ;;  %v1409_v4 = vmax.f32 %v1233_v13, 0.0  ;;  %v1411_v5 = vmax.f32 %v1346_v14, 0.0 }
 0x282   : > { %1472 = vst [vmem:[%s2624_s7 + $0x1e0] sm:$0xff] %v1408_v15  ;;  %1474 = vst [vmem:[%s2624_s7 + $0x1f0] sm:$0xff] %v1410_v3 }
 0x283   : > { %1473 = vst [vmem:[%s2624_s7 + $0x1e8] sm:$0xff] %v1409_v4  ;;  %1475 = vst [vmem:[%s2624_s7 + $0x1f8] sm:$0xff] %v1411_v5 }
 0x284   : > { %2148 = shalt.err (!%p2145_p10)
}
 0x285   : > { %s2149_s9 = scalar_lea.hbm %s2745_s29, 8192  ;;  %s2153_s27 = scalar_lea.hbm %s2803_s6, 16384 }
 0x286   : > { %p2150_p4 = scmp.ne.s32.totalorder %s2745_s29, %s2149_s9  ;;  %p2154_p11 = scmp.lt.u32.totalorder %s2745_s29, %s2803_s6 }
 0x287   : > { %p2155_p1 = scmp.lt.u32.totalorder %s2153_s27, %s2149_s9  ;;  %p2157_p5 = scmp.lt.u32.totalorder %s2149_s9, %s2745_s29 }
 0x288   : > { %p2151_p7 = pnand %p2150_p4, %p2817_p0 }
 0x289   : > { %p2156_p3 = por %p2155_p1, %p2154_p11 }
 0x28a   : > { %p2152_p8 = pneg %p2151_p7 }
 0x28b   : > { %p2158_p9 = por %p2157_p5, %p2156_p3 }
 0x28d   : > { %p2159_p12 = pnand %p2158_p9, %p2152_p8 }
 0x28f   : > { %2162 = shalt.err (!%p2159_p12)
}
 0x290   : > { %s2225_s25 = smov 512   ;;  %s2226_s20 = smov 32  }
 0x291   : > { %1869 = dma.vmem_to_hbm [thread:$0]  (%p2817_p0), %s2747_s30, 8192, %s2745_s29, %s1482_s16, %s2225_s25, %s2225_s25, %s2226_s20  }
 0x292 PF: > { %s1527_s17 = sand.u32 1, %s2197_s21   ;;  %p2818_p2 = scmp.ne.s32.totalorder %s2808_s28, 0 }
 0x293   : > { %p2819_p13 = scmp.ge.s32.totalorder %s2209_s24, 2  ;;  %s1528_s18 = scalar_lea.sflag [#allocation4], %s1527_s17 }
 0x295   : > { %p1884_p6 = pnand %p2819_p13, %p2818_p2 }
 0x297   : > { %2188 = dma.done.wait (!%p1884_p6), %s1528_s18, 2048  }
 0x298   : > { %2190 = vsyncadd (!%p1884_p6), %s1528_s18, 4294965248  ;;  %s1537_s19 = scalar_lea.sflag [#allocation10], %s1527_s17 }
 0x299   : > { %2192 = dma.done.wait (!%p1884_p6), %s1537_s19, 8192  }
 0x29a   : > { %2194 = vsyncadd (!%p1884_p6), %s1537_s19, 4294959104  ;;  %p24_p0 = scmp.ge.s32.totalorder %s2372_s26, 4   ;;  %s2820_s21 = smov %s2201_s22 }
 0x29b   : > { %s2821_s22 = smov %s2205_s23  ;;  %s2822_s23 = smov %s2381_s11 }
 0x29c   : > { %s2823_s24 = smov %s2372_s26  ;;  %26 = sbr.rel (!%p24_p0) target bundleno = 8 (0x8), region = 110 }
 0x2a3   :  { %1542 = vsyncpa [#allocation3], 1 }
 0x2a4   :  { %1544 = vsyncpa [#allocation3 + $0x1], 1 }
 0x2a5   :  { %1545 = vsyncpa [#allocation6], 1 }
 0x2a6   :  { %1546 = vsyncpa [#allocation4], 1 }
 0x2a7   :  { %1548 = vsyncpa [#allocation4 + $0x1], 1 }
 0x2a8   :  { %1549 = vsyncpa [#allocation10], 1 }
 0x2a9   :  { %1551 = vsyncpa [#allocation10 + $0x1], 1 }

</bundles_post_ra>
